<compile_context>
chip_gen: v6e
topology: v6e:2x2x1
jax: 0.10.0
libtpu: 0.0.40
codegen_flags: <defaults>
</compile_context>

<pallas_src>
import jax
import jax.numpy as jnp
from jax.experimental import pallas as pl
from jax.experimental.pallas import tpu as pltpu

INPUT_SIZE = 70
HIDDEN1 = 32
HIDDEN2 = 32
HIDDEN3 = 16
HIDDEN4 = 16
LATENT = 16
BN_EPS = 1e-5

LANES = 128            # every feature dim is zero-padded to one full vreg width
N_W = 10               # 4 encoder + 1 fused head + 5 decoder weight matrices
# PyTorch-style linear layer dims (11 linears; heads 4/5 get fused at packing)
LAYER_DIMS = (
    (INPUT_SIZE, HIDDEN1),   # 0  encoder.input_to_hidden1    (+ Batch1)
    (HIDDEN1, HIDDEN2),      # 1  encoder.hidden1_to_hidden2  (+ Batch2)
    (HIDDEN2, HIDDEN3),      # 2  encoder.hidden2_to_hidden3  (+ Batch3)
    (HIDDEN3, HIDDEN4),      # 3  encoder.hidden3_to_hidden4  (+ Batch4)
    (HIDDEN4, LATENT),       # 4  encoder.hidden4_to_mean
    (HIDDEN4, LATENT),       # 5  encoder.hidden4_to_logvar
    (LATENT, HIDDEN4),       # 6  decoder.latent_to_hidden4   (+ Batch4)
    (HIDDEN4, HIDDEN3),      # 7  decoder.hidden4_to_hidden3  (+ Batch3)
    (HIDDEN3, HIDDEN2),      # 8  decoder.hidden3_to_hidden2  (+ Batch2)
    (HIDDEN2, HIDDEN1),      # 9  decoder.hidden2_to_hidden1  (+ Batch1)
    (HIDDEN1, INPUT_SIZE),   # 10 decoder.hidden1_to_output
)
# Output-row lane slots of the fused head / packed latent row.
LANE_MEAN = 32           # mean duplicated at lanes 0:16 (for latent) and 32:48
LANE_LOGVAR = 64         # logvar at lanes 64:80 (roll by 64 is direction-safe)
# Rows inside the packed vector slab: [gamma, beta] pairs for the 8 BN layers,
# then the fused head-bias row and the output-bias row (the only biases that
# are NOT cancelled by a following training-mode BatchNorm).
ROW_BH, ROW_BO = 16, 17
N_VEC_ROWS = 24          # 18 used rows, padded to a multiple of 8


# ----------------------------------------------------------------------------
# Kernel
# ----------------------------------------------------------------------------
def _vae_fwd_kernel(xe_ref, w_ref, v_ref, out_ref):
    # xe_ref:  (2, n, 128)  row 0 = x (lanes >= 70 zero), row 1 = eps (>=16 zero)
    # w_ref:   (10, 128, 128) bf16 zero-padded weights, y = x @ W
    # v_ref:   (24, 128) f32   BN gamma/beta rows + head/output bias rows
    # out_ref: (2, n, 128)     row 0 = x_recon, row 1 = [latent|mean|logvar]

    def mm(h, i):
        # bf16 operands, f32 MXU accumulation (default single-pass precision)
        return jnp.dot(h.astype(jnp.bfloat16), w_ref[i],
                       preferred_element_type=jnp.float32)

    def vec(r):
        return v_ref[pl.ds(r, 1), :]          # (1, 128) row, broadcast over batch

    def bn_relu(h, bn_idx):
        # BatchNorm1d, training mode.  One-pass stats: the two axis-0 reduces
        # are independent and overlap in the XLU; var = E[h^2] - mean^2.
        mu = jnp.mean(h, axis=0, keepdims=True)
        ex2 = jnp.mean(h * h, axis=0, keepdims=True)
        var = ex2 - mu * mu
        scale = vec(2 * bn_idx) * jax.lax.rsqrt(var + BN_EPS)   # gamma folded in
        shift = vec(2 * bn_idx + 1) - mu * scale                # beta - mu*scale
        return jnp.maximum(h * scale + shift, 0.0)

    x = xe_ref[0]
    eps = xe_ref[1]

    # ---- Encoder (pre-BN biases omitted: exactly cancelled by the BN mean) ----
    h = bn_relu(mm(x, 0), 0)
    h = bn_relu(mm(h, 1), 1)
    h = bn_relu(mm(h, 2), 2)
    h = bn_relu(mm(h, 3), 3)

    # ---- Fused mean/logvar head ----
    # heads lanes: [0:16]=mean, [32:48]=mean, [64:80]=logvar, elsewhere exactly 0.
    heads = mm(h, 4) + vec(ROW_BH)
    # Bring logvar to lanes 0:16 (aligned with eps).  A rotate by 64 of a
    # 128-lane vreg maps lanes 64:80 -> 0:16 in either rotation direction, so
    # this is robust; the other lanes of the rolled value are killed by eps==0.
    lv_lo = pltpu.roll(heads, shift=64, axis=1)
    # Reparameterization add directly yields the packed output row:
    #   lanes 0:16 = eps*std + mean = latent, 32:48 = mean, 64:80 = logvar.
    latent_packed = eps * jnp.exp(0.5 * lv_lo) + heads

    # ---- Decoder (W rows outside 0:16 are zero, so the extra packed lanes of
    #      latent_packed contribute exactly nothing) ----
    d = bn_relu(mm(latent_packed, 5), 4)
    d = bn_relu(mm(d, 6), 5)
    d = bn_relu(mm(d, 7), 6)
    d = bn_relu(mm(d, 8), 7)
    out = mm(d, 9) + vec(ROW_BO)

    # sigmoid(x) == 0.5*tanh(0.5*x) + 0.5  (single transcendental)
    out_ref[0] = 0.5 * jnp.tanh(0.5 * out) + 0.5
    out_ref[1] = latent_packed


# ----------------------------------------------------------------------------
# Wrapper
# ----------------------------------------------------------------------------
@jax.jit
def autoencoder_forward(x, eps, wslab, vslab):
    n = x.shape[0]
    # Single (2, n, 128) input slab: one pad/stack fusion in, one DMA.
    xe = jnp.stack([
        jnp.pad(x, ((0, 0), (0, LANES - INPUT_SIZE))),
        jnp.pad(eps, ((0, 0), (0, LANES - LATENT))),
    ])

    vmem = pl.BlockSpec(memory_space=pltpu.MemorySpace.VMEM)
    packed = pl.pallas_call(
        _vae_fwd_kernel,
        out_shape=jax.ShapeDtypeStruct((2, n, LANES), jnp.float32),
        in_specs=[vmem, vmem, vmem],
        out_specs=vmem,
        # No grid: the whole problem (<0.5 MiB) lives in VMEM on one TensorCore.
        # TODO(synk): for large batches add a batch grid ("parallel" so v7x's
        # second TensorCore is used) with two-pass / partial-sum BN statistics
        # and an explicit vmem_limit_bytes sized for v7x's 64 MiB VMEM.
    )(xe, wslab, vslab)

    x_recon = packed[0, :, :INPUT_SIZE]
    latent = packed[1, :, 0:LATENT]
    latent_mean = packed[1, :, LANE_MEAN:LANE_MEAN + LATENT]
    latent_logvar = packed[1, :, LANE_LOGVAR:LANE_LOGVAR + LATENT]
    return x_recon, latent, latent_mean, latent_logvar


# ----------------------------------------------------------------------------
# Parameters (PyTorch-shaped) and packing into the two slabs
# ----------------------------------------------------------------------------
def init_params(key):
    """Synthetic params matching the module: Linear weights/biases + BN affine.

    BN gamma/beta are perturbed away from the PyTorch defaults (1/0) so the
    correctness check actually exercises the affine packing.
    """
    keys = jax.random.split(key, len(LAYER_DIMS))
    linears = []
    for k, (fi, fo) in zip(keys, LAYER_DIMS):
        kw, kb = jax.random.split(k)
        bound = 1.0 / (float(fi) ** 0.5)
        w = jax.random.uniform(kw, (fi, fo), jnp.float32, -bound, bound)
        b = jax.random.uniform(kb, (1, fo), jnp.float32, -bound, bound)
        linears.append((w, b))
    bns = []
    kg = jax.random.PRNGKey(1)
    for i in (0, 1, 2, 3, 6, 7, 8, 9):            # linears followed by a BN
        fo = LAYER_DIMS[i][1]
        kg, k1, k2 = jax.random.split(kg, 3)
        gamma = 1.0 + 0.1 * jax.random.normal(k1, (1, fo), jnp.float32)
        beta = 0.1 * jax.random.normal(k2, (1, fo), jnp.float32)
        bns.append((gamma, beta))
    return {"linears": linears, "bns": bns}


def pack_params(params):
    """Pack all parameters into 2 pre-padded slabs (2 parameter DMAs total).

    * Weight slab is bfloat16 (MXU already runs a single bf16 pass at default
      precision, so accuracy is unchanged but DMA/VMEM traffic is halved).
    * Biases of linears feeding a training-mode BatchNorm are NOT packed:
      y = xW + b has b exactly cancelled by the batch-mean subtraction.
    * The two 16-wide heads are fused into one 128x128 weight with W_mean at
      cols 0:16 and 32:48 (duplicated) and W_logvar at cols 64:80, so the
      kernel's reparameterization add directly produces the packed output row.
    """
    lin = params["linears"]
    wslab = jnp.zeros((N_W, LANES, LANES), jnp.float32)
    for dst, src in enumerate((0, 1, 2, 3)):                 # encoder
        w = lin[src][0]
        fi, fo = w.shape
        wslab = wslab.at[dst, :fi, :fo].set(w)
    wm, bm = lin[4]
    wl, bl = lin[5]
    wslab = wslab.at[4, :HIDDEN4, 0:LATENT].set(wm)          # fused head
    wslab = wslab.at[4, :HIDDEN4, LANE_MEAN:LANE_MEAN + LATENT].set(wm)
    wslab = wslab.at[4, :HIDDEN4, LANE_LOGVAR:LANE_LOGVAR + LATENT].set(wl)
    for dst, src in zip(range(5, 10), range(6, 11)):         # decoder
        w = lin[src][0]
        fi, fo = w.shape
        wslab = wslab.at[dst, :fi, :fo].set(w)
    wslab = wslab.astype(jnp.bfloat16)

    vslab = jnp.zeros((N_VEC_ROWS, LANES), jnp.float32)
    for j, (g, b) in enumerate(params["bns"]):
        fo = g.shape[-1]
        vslab = vslab.at[2 * j, :fo].set(g.reshape(-1))
        vslab = vslab.at[2 * j + 1, :fo].set(b.reshape(-1))
    vslab = vslab.at[ROW_BH, 0:LATENT].set(bm.reshape(-1))
    vslab = vslab.at[ROW_BH, LANE_MEAN:LANE_MEAN + LATENT].set(bm.reshape(-1))
    vslab = vslab.at[ROW_BH, LANE_LOGVAR:LANE_LOGVAR + LATENT].set(bl.reshape(-1))
    vslab = vslab.at[ROW_BO, :INPUT_SIZE].set(lin[10][1].reshape(-1))
    return wslab, vslab


# ----------------------------------------------------------------------------
# Pure-JAX reference (mirrors the PyTorch forward structurally; matmul inputs
# are pre-rounded to bf16 so kernel and reference see identical MXU operands,
# which keeps the comparison tight and seed-independent).
# ----------------------------------------------------------------------------
def _reference_forward(x, eps, params):
    def bf(a):
        return a.astype(jnp.bfloat16).astype(jnp.float32)

    def linear(h, w, b):
        return jnp.dot(bf(h), bf(w), precision=jax.lax.Precision.HIGHEST) + b

    def bn_relu(h, g, be):
        mu = jnp.mean(h, axis=0, keepdims=True)
        var = jnp.mean((h - mu) ** 2, axis=0, keepdims=True)
        return jnp.maximum((h - mu) / jnp.sqrt(var + BN_EPS) * g + be, 0.0)

    lin = params["linears"]
    bns = params["bns"]
    h = x
    for i in range(4):
        h = bn_relu(linear(h, *lin[i]), *bns[i])
    mean = linear(h, *lin[4])
    logvar = linear(h, *lin[5])
    latent = eps * jnp.exp(0.5 * logvar) + mean
    h = latent
    for i in range(4):
        h = bn_relu(linear(h, *lin[6 + i]), *bns[4 + i])
    xrec = jax.nn.sigmoid(linear(h, *lin[10]))
    return xrec, latent, mean, logvar


if __name__ == "__main__":
    key = jax.random.PRNGKey(0)
    k_params, k_x, k_eps = jax.random.split(key, 3)

    batch = 8  # multiple of 8 (f32 sublane)
    x = jax.random.normal(k_x, (batch, INPUT_SIZE), dtype=jnp.float32)
    # eps corresponds to torch.randn_like(std) in the reparameterization trick
    eps = jax.random.normal(k_eps, (batch, LATENT), dtype=jnp.float32)

    params = init_params(k_params)
    wslab, vslab = pack_params(params)

    outs = autoencoder_forward(x, eps, wslab, vslab)
    outs = jax.block_until_ready(outs)
    x_recon, latent, latent_mean, latent_logvar = outs

    # Correctness check: the reference rounds matmul operands to bf16 exactly
    # like the kernel's MXU path, so the residual mismatch is only accumulation
    # order / rsqrt / one-pass-variance noise.  Structural bugs give O(1) errors.
    refs = _reference_forward(x, eps, params)
    for got, want in zip(outs, refs):
        assert got.shape == want.shape and got.dtype == want.dtype
        assert bool(jnp.all(jnp.isfinite(got))), "non-finite output"
        assert jnp.allclose(got, want, atol=3e-2, rtol=3e-2), "mismatch vs reference"

    print("KERNEL_OK")
</pallas_src>

<mosaic_0001>
module attributes {stable_mosaic.version = 11 : i64} {
  func.func @_vae_fwd_kernel(%arg0: memref<2x8x128xf32, #tpu.memory_space<vmem>>, %arg1: memref<10x128x128xbf16, #tpu.memory_space<vmem>>, %arg2: memref<24x128xf32, #tpu.memory_space<vmem>>, %arg3: memref<2x8x128xf32, #tpu.memory_space<vmem>>) attributes {dimension_semantics = [], scalar_prefetch = 0 : i64, scratch_operands = 0 : i64, tpu.core_type = #tpu.core_type<tc>} {
    %c0 = arith.constant 0 : index
    %c0_0 = arith.constant 0 : index
    %c0_1 = arith.constant 0 : index
    %0 = vector.load %arg0[%c0, %c0_0, %c0_1] : memref<2x8x128xf32, #tpu.memory_space<vmem>>, vector<1x8x128xf32>
    %1 = vector.shape_cast %0 : vector<1x8x128xf32> to vector<8x128xf32>
    %c1 = arith.constant 1 : index
    %c0_2 = arith.constant 0 : index
    %c0_3 = arith.constant 0 : index
    %2 = vector.load %arg0[%c1, %c0_2, %c0_3] : memref<2x8x128xf32, #tpu.memory_space<vmem>>, vector<1x8x128xf32>
    %3 = vector.shape_cast %2 : vector<1x8x128xf32> to vector<8x128xf32>
    %4 = arith.truncf %1 : vector<8x128xf32> to vector<8x128xbf16>
    %c0_4 = arith.constant 0 : index
    %c0_5 = arith.constant 0 : index
    %c0_6 = arith.constant 0 : index
    %5 = vector.load %arg1[%c0_4, %c0_5, %c0_6] : memref<10x128x128xbf16, #tpu.memory_space<vmem>>, vector<1x128x128xbf16>
    %6 = vector.shape_cast %5 : vector<1x128x128xbf16> to vector<128x128xbf16>
    %cst = arith.constant dense<0.000000e+00> : vector<8x128xf32>
    %7 = tpu.matmul %4, %6, %cst {dimension_numbers = #tpu.dot_dimension_numbers<[1], [0], [0], [1], [0, 0, 1, 1], [], []>} : vector<8x128xbf16>, vector<128x128xbf16>, vector<8x128xf32> -> vector<8x128xf32>
    %cst_7 = arith.constant dense<0.000000e+00> : vector<128xf32>
    %8 = vector.multi_reduction <add>, %7, %cst_7 [0] : vector<8x128xf32> to vector<128xf32>
    %9 = vector.shape_cast %8 : vector<128xf32> to vector<1x128xf32>
    %cst_8 = arith.constant 8.000000e+00 : f32
    %10 = vector.broadcast %cst_8 : f32 to vector<1x128xf32>
    %11 = arith.divf %9, %10 : vector<1x128xf32>
    %12 = arith.mulf %7, %7 : vector<8x128xf32>
    %cst_9 = arith.constant dense<0.000000e+00> : vector<128xf32>
    %13 = vector.multi_reduction <add>, %12, %cst_9 [0] : vector<8x128xf32> to vector<128xf32>
    %14 = vector.shape_cast %13 : vector<128xf32> to vector<1x128xf32>
    %cst_10 = arith.constant 8.000000e+00 : f32
    %15 = vector.broadcast %cst_10 : f32 to vector<1x128xf32>
    %16 = arith.divf %14, %15 : vector<1x128xf32>
    %17 = arith.mulf %11, %11 : vector<1x128xf32>
    %18 = arith.subf %16, %17 : vector<1x128xf32>
    %c0_11 = arith.constant 0 : index
    %c0_12 = arith.constant 0 : index
    %19 = vector.load %arg2[%c0_11, %c0_12] : memref<24x128xf32, #tpu.memory_space<vmem>>, vector<1x128xf32>
    %cst_13 = arith.constant 9.99999974E-6 : f32
    %20 = vector.broadcast %cst_13 : f32 to vector<1x128xf32>
    %21 = arith.addf %18, %20 : vector<1x128xf32>
    %22 = math.rsqrt %21 : vector<1x128xf32>
    %23 = arith.mulf %19, %22 : vector<1x128xf32>
    %c1_14 = arith.constant 1 : index
    %c0_15 = arith.constant 0 : index
    %24 = vector.load %arg2[%c1_14, %c0_15] : memref<24x128xf32, #tpu.memory_space<vmem>>, vector<1x128xf32>
    %25 = arith.mulf %11, %23 : vector<1x128xf32>
    %26 = arith.subf %24, %25 : vector<1x128xf32>
    %27 = vector.broadcast %23 : vector<1x128xf32> to vector<8x128xf32>
    %28 = arith.mulf %7, %27 : vector<8x128xf32>
    %29 = vector.broadcast %26 : vector<1x128xf32> to vector<8x128xf32>
    %30 = arith.addf %28, %29 : vector<8x128xf32>
    %cst_16 = arith.constant 0.000000e+00 : f32
    %31 = vector.broadcast %cst_16 : f32 to vector<8x128xf32>
    %32 = arith.maximumf %30, %31 : vector<8x128xf32>
    %33 = arith.truncf %32 : vector<8x128xf32> to vector<8x128xbf16>
    %c1_17 = arith.constant 1 : index
    %c0_18 = arith.constant 0 : index
    %c0_19 = arith.constant 0 : index
    %34 = vector.load %arg1[%c1_17, %c0_18, %c0_19] : memref<10x128x128xbf16, #tpu.memory_space<vmem>>, vector<1x128x128xbf16>
    %35 = vector.shape_cast %34 : vector<1x128x128xbf16> to vector<128x128xbf16>
    %cst_20 = arith.constant dense<0.000000e+00> : vector<8x128xf32>
    %36 = tpu.matmul %33, %35, %cst_20 {dimension_numbers = #tpu.dot_dimension_numbers<[1], [0], [0], [1], [0, 0, 1, 1], [], []>} : vector<8x128xbf16>, vector<128x128xbf16>, vector<8x128xf32> -> vector<8x128xf32>
    %cst_21 = arith.constant dense<0.000000e+00> : vector<128xf32>
    %37 = vector.multi_reduction <add>, %36, %cst_21 [0] : vector<8x128xf32> to vector<128xf32>
    %38 = vector.shape_cast %37 : vector<128xf32> to vector<1x128xf32>
    %cst_22 = arith.constant 8.000000e+00 : f32
    %39 = vector.broadcast %cst_22 : f32 to vector<1x128xf32>
    %40 = arith.divf %38, %39 : vector<1x128xf32>
    %41 = arith.mulf %36, %36 : vector<8x128xf32>
    %cst_23 = arith.constant dense<0.000000e+00> : vector<128xf32>
    %42 = vector.multi_reduction <add>, %41, %cst_23 [0] : vector<8x128xf32> to vector<128xf32>
    %43 = vector.shape_cast %42 : vector<128xf32> to vector<1x128xf32>
    %cst_24 = arith.constant 8.000000e+00 : f32
    %44 = vector.broadcast %cst_24 : f32 to vector<1x128xf32>
    %45 = arith.divf %43, %44 : vector<1x128xf32>
    %46 = arith.mulf %40, %40 : vector<1x128xf32>
    %47 = arith.subf %45, %46 : vector<1x128xf32>
    %c2 = arith.constant 2 : index
    %c0_25 = arith.constant 0 : index
    %48 = vector.load %arg2[%c2, %c0_25] : memref<24x128xf32, #tpu.memory_space<vmem>>, vector<1x128xf32>
    %cst_26 = arith.constant 9.99999974E-6 : f32
    %49 = vector.broadcast %cst_26 : f32 to vector<1x128xf32>
    %50 = arith.addf %47, %49 : vector<1x128xf32>
    %51 = math.rsqrt %50 : vector<1x128xf32>
    %52 = arith.mulf %48, %51 : vector<1x128xf32>
    %c3 = arith.constant 3 : index
    %c0_27 = arith.constant 0 : index
    %53 = vector.load %arg2[%c3, %c0_27] : memref<24x128xf32, #tpu.memory_space<vmem>>, vector<1x128xf32>
    %54 = arith.mulf %40, %52 : vector<1x128xf32>
    %55 = arith.subf %53, %54 : vector<1x128xf32>
    %56 = vector.broadcast %52 : vector<1x128xf32> to vector<8x128xf32>
    %57 = arith.mulf %36, %56 : vector<8x128xf32>
    %58 = vector.broadcast %55 : vector<1x128xf32> to vector<8x128xf32>
    %59 = arith.addf %57, %58 : vector<8x128xf32>
    %cst_28 = arith.constant 0.000000e+00 : f32
    %60 = vector.broadcast %cst_28 : f32 to vector<8x128xf32>
    %61 = arith.maximumf %59, %60 : vector<8x128xf32>
    %62 = arith.truncf %61 : vector<8x128xf32> to vector<8x128xbf16>
    %c2_29 = arith.constant 2 : index
    %c0_30 = arith.constant 0 : index
    %c0_31 = arith.constant 0 : index
    %63 = vector.load %arg1[%c2_29, %c0_30, %c0_31] : memref<10x128x128xbf16, #tpu.memory_space<vmem>>, vector<1x128x128xbf16>
    %64 = vector.shape_cast %63 : vector<1x128x128xbf16> to vector<128x128xbf16>
    %cst_32 = arith.constant dense<0.000000e+00> : vector<8x128xf32>
    %65 = tpu.matmul %62, %64, %cst_32 {dimension_numbers = #tpu.dot_dimension_numbers<[1], [0], [0], [1], [0, 0, 1, 1], [], []>} : vector<8x128xbf16>, vector<128x128xbf16>, vector<8x128xf32> -> vector<8x128xf32>
    %cst_33 = arith.constant dense<0.000000e+00> : vector<128xf32>
    %66 = vector.multi_reduction <add>, %65, %cst_33 [0] : vector<8x128xf32> to vector<128xf32>
    %67 = vector.shape_cast %66 : vector<128xf32> to vector<1x128xf32>
    %cst_34 = arith.constant 8.000000e+00 : f32
    %68 = vector.broadcast %cst_34 : f32 to vector<1x128xf32>
    %69 = arith.divf %67, %68 : vector<1x128xf32>
    %70 = arith.mulf %65, %65 : vector<8x128xf32>
    %cst_35 = arith.constant dense<0.000000e+00> : vector<128xf32>
    %71 = vector.multi_reduction <add>, %70, %cst_35 [0] : vector<8x128xf32> to vector<128xf32>
    %72 = vector.shape_cast %71 : vector<128xf32> to vector<1x128xf32>
    %cst_36 = arith.constant 8.000000e+00 : f32
    %73 = vector.broadcast %cst_36 : f32 to vector<1x128xf32>
    %74 = arith.divf %72, %73 : vector<1x128xf32>
    %75 = arith.mulf %69, %69 : vector<1x128xf32>
    %76 = arith.subf %74, %75 : vector<1x128xf32>
    %c4 = arith.constant 4 : index
    %c0_37 = arith.constant 0 : index
    %77 = vector.load %arg2[%c4, %c0_37] : memref<24x128xf32, #tpu.memory_space<vmem>>, vector<1x128xf32>
    %cst_38 = arith.constant 9.99999974E-6 : f32
    %78 = vector.broadcast %cst_38 : f32 to vector<1x128xf32>
    %79 = arith.addf %76, %78 : vector<1x128xf32>
    %80 = math.rsqrt %79 : vector<1x128xf32>
    %81 = arith.mulf %77, %80 : vector<1x128xf32>
    %c5 = arith.constant 5 : index
    %c0_39 = arith.constant 0 : index
    %82 = vector.load %arg2[%c5, %c0_39] : memref<24x128xf32, #tpu.memory_space<vmem>>, vector<1x128xf32>
    %83 = arith.mulf %69, %81 : vector<1x128xf32>
    %84 = arith.subf %82, %83 : vector<1x128xf32>
    %85 = vector.broadcast %81 : vector<1x128xf32> to vector<8x128xf32>
    %86 = arith.mulf %65, %85 : vector<8x128xf32>
    %87 = vector.broadcast %84 : vector<1x128xf32> to vector<8x128xf32>
    %88 = arith.addf %86, %87 : vector<8x128xf32>
    %cst_40 = arith.constant 0.000000e+00 : f32
    %89 = vector.broadcast %cst_40 : f32 to vector<8x128xf32>
    %90 = arith.maximumf %88, %89 : vector<8x128xf32>
    %91 = arith.truncf %90 : vector<8x128xf32> to vector<8x128xbf16>
    %c3_41 = arith.constant 3 : index
    %c0_42 = arith.constant 0 : index
    %c0_43 = arith.constant 0 : index
    %92 = vector.load %arg1[%c3_41, %c0_42, %c0_43] : memref<10x128x128xbf16, #tpu.memory_space<vmem>>, vector<1x128x128xbf16>
    %93 = vector.shape_cast %92 : vector<1x128x128xbf16> to vector<128x128xbf16>
    %cst_44 = arith.constant dense<0.000000e+00> : vector<8x128xf32>
    %94 = tpu.matmul %91, %93, %cst_44 {dimension_numbers = #tpu.dot_dimension_numbers<[1], [0], [0], [1], [0, 0, 1, 1], [], []>} : vector<8x128xbf16>, vector<128x128xbf16>, vector<8x128xf32> -> vector<8x128xf32>
    %cst_45 = arith.constant dense<0.000000e+00> : vector<128xf32>
    %95 = vector.multi_reduction <add>, %94, %cst_45 [0] : vector<8x128xf32> to vector<128xf32>
    %96 = vector.shape_cast %95 : vector<128xf32> to vector<1x128xf32>
    %cst_46 = arith.constant 8.000000e+00 : f32
    %97 = vector.broadcast %cst_46 : f32 to vector<1x128xf32>
    %98 = arith.divf %96, %97 : vector<1x128xf32>
    %99 = arith.mulf %94, %94 : vector<8x128xf32>
    %cst_47 = arith.constant dense<0.000000e+00> : vector<128xf32>
    %100 = vector.multi_reduction <add>, %99, %cst_47 [0] : vector<8x128xf32> to vector<128xf32>
    %101 = vector.shape_cast %100 : vector<128xf32> to vector<1x128xf32>
    %cst_48 = arith.constant 8.000000e+00 : f32
    %102 = vector.broadcast %cst_48 : f32 to vector<1x128xf32>
    %103 = arith.divf %101, %102 : vector<1x128xf32>
    %104 = arith.mulf %98, %98 : vector<1x128xf32>
    %105 = arith.subf %103, %104 : vector<1x128xf32>
    %c6 = arith.constant 6 : index
    %c0_49 = arith.constant 0 : index
    %106 = vector.load %arg2[%c6, %c0_49] : memref<24x128xf32, #tpu.memory_space<vmem>>, vector<1x128xf32>
    %cst_50 = arith.constant 9.99999974E-6 : f32
    %107 = vector.broadcast %cst_50 : f32 to vector<1x128xf32>
    %108 = arith.addf %105, %107 : vector<1x128xf32>
    %109 = math.rsqrt %108 : vector<1x128xf32>
    %110 = arith.mulf %106, %109 : vector<1x128xf32>
    %c7 = arith.constant 7 : index
    %c0_51 = arith.constant 0 : index
    %111 = vector.load %arg2[%c7, %c0_51] : memref<24x128xf32, #tpu.memory_space<vmem>>, vector<1x128xf32>
    %112 = arith.mulf %98, %110 : vector<1x128xf32>
    %113 = arith.subf %111, %112 : vector<1x128xf32>
    %114 = vector.broadcast %110 : vector<1x128xf32> to vector<8x128xf32>
    %115 = arith.mulf %94, %114 : vector<8x128xf32>
    %116 = vector.broadcast %113 : vector<1x128xf32> to vector<8x128xf32>
    %117 = arith.addf %115, %116 : vector<8x128xf32>
    %cst_52 = arith.constant 0.000000e+00 : f32
    %118 = vector.broadcast %cst_52 : f32 to vector<8x128xf32>
    %119 = arith.maximumf %117, %118 : vector<8x128xf32>
    %120 = arith.truncf %119 : vector<8x128xf32> to vector<8x128xbf16>
    %c4_53 = arith.constant 4 : index
    %c0_54 = arith.constant 0 : index
    %c0_55 = arith.constant 0 : index
    %121 = vector.load %arg1[%c4_53, %c0_54, %c0_55] : memref<10x128x128xbf16, #tpu.memory_space<vmem>>, vector<1x128x128xbf16>
    %122 = vector.shape_cast %121 : vector<1x128x128xbf16> to vector<128x128xbf16>
    %cst_56 = arith.constant dense<0.000000e+00> : vector<8x128xf32>
    %123 = tpu.matmul %120, %122, %cst_56 {dimension_numbers = #tpu.dot_dimension_numbers<[1], [0], [0], [1], [0, 0, 1, 1], [], []>} : vector<8x128xbf16>, vector<128x128xbf16>, vector<8x128xf32> -> vector<8x128xf32>
    %c16 = arith.constant 16 : index
    %c0_57 = arith.constant 0 : index
    %124 = vector.load %arg2[%c16, %c0_57] : memref<24x128xf32, #tpu.memory_space<vmem>>, vector<1x128xf32>
    %125 = vector.broadcast %124 : vector<1x128xf32> to vector<8x128xf32>
    %126 = arith.addf %123, %125 : vector<8x128xf32>
    %c64_i32 = arith.constant 64 : i32
    %127 = tpu.dynamic_rotate %126 by %c64_i32 dim 1 : vector<8x128xf32>, i32 -> vector<8x128xf32>
    %cst_58 = arith.constant 5.000000e-01 : f32
    %128 = vector.broadcast %cst_58 : f32 to vector<8x128xf32>
    %129 = arith.mulf %128, %127 : vector<8x128xf32>
    %130 = math.exp %129 : vector<8x128xf32>
    %131 = arith.mulf %3, %130 : vector<8x128xf32>
    %132 = arith.addf %131, %126 : vector<8x128xf32>
    %133 = arith.truncf %132 : vector<8x128xf32> to vector<8x128xbf16>
    %c5_59 = arith.constant 5 : index
    %c0_60 = arith.constant 0 : index
    %c0_61 = arith.constant 0 : index
    %134 = vector.load %arg1[%c5_59, %c0_60, %c0_61] : memref<10x128x128xbf16, #tpu.memory_space<vmem>>, vector<1x128x128xbf16>
    %135 = vector.shape_cast %134 : vector<1x128x128xbf16> to vector<128x128xbf16>
    %cst_62 = arith.constant dense<0.000000e+00> : vector<8x128xf32>
    %136 = tpu.matmul %133, %135, %cst_62 {dimension_numbers = #tpu.dot_dimension_numbers<[1], [0], [0], [1], [0, 0, 1, 1], [], []>} : vector<8x128xbf16>, vector<128x128xbf16>, vector<8x128xf32> -> vector<8x128xf32>
    %cst_63 = arith.constant dense<0.000000e+00> : vector<128xf32>
    %137 = vector.multi_reduction <add>, %136, %cst_63 [0] : vector<8x128xf32> to vector<128xf32>
    %138 = vector.shape_cast %137 : vector<128xf32> to vector<1x128xf32>
    %cst_64 = arith.constant 8.000000e+00 : f32
    %139 = vector.broadcast %cst_64 : f32 to vector<1x128xf32>
    %140 = arith.divf %138, %139 : vector<1x128xf32>
    %141 = arith.mulf %136, %136 : vector<8x128xf32>
    %cst_65 = arith.constant dense<0.000000e+00> : vector<128xf32>
    %142 = vector.multi_reduction <add>, %141, %cst_65 [0] : vector<8x128xf32> to vector<128xf32>
    %143 = vector.shape_cast %142 : vector<128xf32> to vector<1x128xf32>
    %cst_66 = arith.constant 8.000000e+00 : f32
    %144 = vector.broadcast %cst_66 : f32 to vector<1x128xf32>
    %145 = arith.divf %143, %144 : vector<1x128xf32>
    %146 = arith.mulf %140, %140 : vector<1x128xf32>
    %147 = arith.subf %145, %146 : vector<1x128xf32>
    %c8 = arith.constant 8 : index
    %c0_67 = arith.constant 0 : index
    %148 = vector.load %arg2[%c8, %c0_67] : memref<24x128xf32, #tpu.memory_space<vmem>>, vector<1x128xf32>
    %cst_68 = arith.constant 9.99999974E-6 : f32
    %149 = vector.broadcast %cst_68 : f32 to vector<1x128xf32>
    %150 = arith.addf %147, %149 : vector<1x128xf32>
    %151 = math.rsqrt %150 : vector<1x128xf32>
    %152 = arith.mulf %148, %151 : vector<1x128xf32>
    %c9 = arith.constant 9 : index
    %c0_69 = arith.constant 0 : index
    %153 = vector.load %arg2[%c9, %c0_69] : memref<24x128xf32, #tpu.memory_space<vmem>>, vector<1x128xf32>
    %154 = arith.mulf %140, %152 : vector<1x128xf32>
    %155 = arith.subf %153, %154 : vector<1x128xf32>
    %156 = vector.broadcast %152 : vector<1x128xf32> to vector<8x128xf32>
    %157 = arith.mulf %136, %156 : vector<8x128xf32>
    %158 = vector.broadcast %155 : vector<1x128xf32> to vector<8x128xf32>
    %159 = arith.addf %157, %158 : vector<8x128xf32>
    %cst_70 = arith.constant 0.000000e+00 : f32
    %160 = vector.broadcast %cst_70 : f32 to vector<8x128xf32>
    %161 = arith.maximumf %159, %160 : vector<8x128xf32>
    %162 = arith.truncf %161 : vector<8x128xf32> to vector<8x128xbf16>
    %c6_71 = arith.constant 6 : index
    %c0_72 = arith.constant 0 : index
    %c0_73 = arith.constant 0 : index
    %163 = vector.load %arg1[%c6_71, %c0_72, %c0_73] : memref<10x128x128xbf16, #tpu.memory_space<vmem>>, vector<1x128x128xbf16>
    %164 = vector.shape_cast %163 : vector<1x128x128xbf16> to vector<128x128xbf16>
    %cst_74 = arith.constant dense<0.000000e+00> : vector<8x128xf32>
    %165 = tpu.matmul %162, %164, %cst_74 {dimension_numbers = #tpu.dot_dimension_numbers<[1], [0], [0], [1], [0, 0, 1, 1], [], []>} : vector<8x128xbf16>, vector<128x128xbf16>, vector<8x128xf32> -> vector<8x128xf32>
    %cst_75 = arith.constant dense<0.000000e+00> : vector<128xf32>
    %166 = vector.multi_reduction <add>, %165, %cst_75 [0] : vector<8x128xf32> to vector<128xf32>
    %167 = vector.shape_cast %166 : vector<128xf32> to vector<1x128xf32>
    %cst_76 = arith.constant 8.000000e+00 : f32
    %168 = vector.broadcast %cst_76 : f32 to vector<1x128xf32>
    %169 = arith.divf %167, %168 : vector<1x128xf32>
    %170 = arith.mulf %165, %165 : vector<8x128xf32>
    %cst_77 = arith.constant dense<0.000000e+00> : vector<128xf32>
    %171 = vector.multi_reduction <add>, %170, %cst_77 [0] : vector<8x128xf32> to vector<128xf32>
    %172 = vector.shape_cast %171 : vector<128xf32> to vector<1x128xf32>
    %cst_78 = arith.constant 8.000000e+00 : f32
    %173 = vector.broadcast %cst_78 : f32 to vector<1x128xf32>
    %174 = arith.divf %172, %173 : vector<1x128xf32>
    %175 = arith.mulf %169, %169 : vector<1x128xf32>
    %176 = arith.subf %174, %175 : vector<1x128xf32>
    %c10 = arith.constant 10 : index
    %c0_79 = arith.constant 0 : index
    %177 = vector.load %arg2[%c10, %c0_79] : memref<24x128xf32, #tpu.memory_space<vmem>>, vector<1x128xf32>
    %cst_80 = arith.constant 9.99999974E-6 : f32
    %178 = vector.broadcast %cst_80 : f32 to vector<1x128xf32>
    %179 = arith.addf %176, %178 : vector<1x128xf32>
    %180 = math.rsqrt %179 : vector<1x128xf32>
    %181 = arith.mulf %177, %180 : vector<1x128xf32>
    %c11 = arith.constant 11 : index
    %c0_81 = arith.constant 0 : index
    %182 = vector.load %arg2[%c11, %c0_81] : memref<24x128xf32, #tpu.memory_space<vmem>>, vector<1x128xf32>
    %183 = arith.mulf %169, %181 : vector<1x128xf32>
    %184 = arith.subf %182, %183 : vector<1x128xf32>
    %185 = vector.broadcast %181 : vector<1x128xf32> to vector<8x128xf32>
    %186 = arith.mulf %165, %185 : vector<8x128xf32>
    %187 = vector.broadcast %184 : vector<1x128xf32> to vector<8x128xf32>
    %188 = arith.addf %186, %187 : vector<8x128xf32>
    %cst_82 = arith.constant 0.000000e+00 : f32
    %189 = vector.broadcast %cst_82 : f32 to vector<8x128xf32>
    %190 = arith.maximumf %188, %189 : vector<8x128xf32>
    %191 = arith.truncf %190 : vector<8x128xf32> to vector<8x128xbf16>
    %c7_83 = arith.constant 7 : index
    %c0_84 = arith.constant 0 : index
    %c0_85 = arith.constant 0 : index
    %192 = vector.load %arg1[%c7_83, %c0_84, %c0_85] : memref<10x128x128xbf16, #tpu.memory_space<vmem>>, vector<1x128x128xbf16>
    %193 = vector.shape_cast %192 : vector<1x128x128xbf16> to vector<128x128xbf16>
    %cst_86 = arith.constant dense<0.000000e+00> : vector<8x128xf32>
    %194 = tpu.matmul %191, %193, %cst_86 {dimension_numbers = #tpu.dot_dimension_numbers<[1], [0], [0], [1], [0, 0, 1, 1], [], []>} : vector<8x128xbf16>, vector<128x128xbf16>, vector<8x128xf32> -> vector<8x128xf32>
    %cst_87 = arith.constant dense<0.000000e+00> : vector<128xf32>
    %195 = vector.multi_reduction <add>, %194, %cst_87 [0] : vector<8x128xf32> to vector<128xf32>
    %196 = vector.shape_cast %195 : vector<128xf32> to vector<1x128xf32>
    %cst_88 = arith.constant 8.000000e+00 : f32
    %197 = vector.broadcast %cst_88 : f32 to vector<1x128xf32>
    %198 = arith.divf %196, %197 : vector<1x128xf32>
    %199 = arith.mulf %194, %194 : vector<8x128xf32>
    %cst_89 = arith.constant dense<0.000000e+00> : vector<128xf32>
    %200 = vector.multi_reduction <add>, %199, %cst_89 [0] : vector<8x128xf32> to vector<128xf32>
    %201 = vector.shape_cast %200 : vector<128xf32> to vector<1x128xf32>
    %cst_90 = arith.constant 8.000000e+00 : f32
    %202 = vector.broadcast %cst_90 : f32 to vector<1x128xf32>
    %203 = arith.divf %201, %202 : vector<1x128xf32>
    %204 = arith.mulf %198, %198 : vector<1x128xf32>
    %205 = arith.subf %203, %204 : vector<1x128xf32>
    %c12 = arith.constant 12 : index
    %c0_91 = arith.constant 0 : index
    %206 = vector.load %arg2[%c12, %c0_91] : memref<24x128xf32, #tpu.memory_space<vmem>>, vector<1x128xf32>
    %cst_92 = arith.constant 9.99999974E-6 : f32
    %207 = vector.broadcast %cst_92 : f32 to vector<1x128xf32>
    %208 = arith.addf %205, %207 : vector<1x128xf32>
    %209 = math.rsqrt %208 : vector<1x128xf32>
    %210 = arith.mulf %206, %209 : vector<1x128xf32>
    %c13 = arith.constant 13 : index
    %c0_93 = arith.constant 0 : index
    %211 = vector.load %arg2[%c13, %c0_93] : memref<24x128xf32, #tpu.memory_space<vmem>>, vector<1x128xf32>
    %212 = arith.mulf %198, %210 : vector<1x128xf32>
    %213 = arith.subf %211, %212 : vector<1x128xf32>
    %214 = vector.broadcast %210 : vector<1x128xf32> to vector<8x128xf32>
    %215 = arith.mulf %194, %214 : vector<8x128xf32>
    %216 = vector.broadcast %213 : vector<1x128xf32> to vector<8x128xf32>
    %217 = arith.addf %215, %216 : vector<8x128xf32>
    %cst_94 = arith.constant 0.000000e+00 : f32
    %218 = vector.broadcast %cst_94 : f32 to vector<8x128xf32>
    %219 = arith.maximumf %217, %218 : vector<8x128xf32>
    %220 = arith.truncf %219 : vector<8x128xf32> to vector<8x128xbf16>
    %c8_95 = arith.constant 8 : index
    %c0_96 = arith.constant 0 : index
    %c0_97 = arith.constant 0 : index
    %221 = vector.load %arg1[%c8_95, %c0_96, %c0_97] : memref<10x128x128xbf16, #tpu.memory_space<vmem>>, vector<1x128x128xbf16>
    %222 = vector.shape_cast %221 : vector<1x128x128xbf16> to vector<128x128xbf16>
    %cst_98 = arith.constant dense<0.000000e+00> : vector<8x128xf32>
    %223 = tpu.matmul %220, %222, %cst_98 {dimension_numbers = #tpu.dot_dimension_numbers<[1], [0], [0], [1], [0, 0, 1, 1], [], []>} : vector<8x128xbf16>, vector<128x128xbf16>, vector<8x128xf32> -> vector<8x128xf32>
    %cst_99 = arith.constant dense<0.000000e+00> : vector<128xf32>
    %224 = vector.multi_reduction <add>, %223, %cst_99 [0] : vector<8x128xf32> to vector<128xf32>
    %225 = vector.shape_cast %224 : vector<128xf32> to vector<1x128xf32>
    %cst_100 = arith.constant 8.000000e+00 : f32
    %226 = vector.broadcast %cst_100 : f32 to vector<1x128xf32>
    %227 = arith.divf %225, %226 : vector<1x128xf32>
    %228 = arith.mulf %223, %223 : vector<8x128xf32>
    %cst_101 = arith.constant dense<0.000000e+00> : vector<128xf32>
    %229 = vector.multi_reduction <add>, %228, %cst_101 [0] : vector<8x128xf32> to vector<128xf32>
    %230 = vector.shape_cast %229 : vector<128xf32> to vector<1x128xf32>
    %cst_102 = arith.constant 8.000000e+00 : f32
    %231 = vector.broadcast %cst_102 : f32 to vector<1x128xf32>
    %232 = arith.divf %230, %231 : vector<1x128xf32>
    %233 = arith.mulf %227, %227 : vector<1x128xf32>
    %234 = arith.subf %232, %233 : vector<1x128xf32>
    %c14 = arith.constant 14 : index
    %c0_103 = arith.constant 0 : index
    %235 = vector.load %arg2[%c14, %c0_103] : memref<24x128xf32, #tpu.memory_space<vmem>>, vector<1x128xf32>
    %cst_104 = arith.constant 9.99999974E-6 : f32
    %236 = vector.broadcast %cst_104 : f32 to vector<1x128xf32>
    %237 = arith.addf %234, %236 : vector<1x128xf32>
    %238 = math.rsqrt %237 : vector<1x128xf32>
    %239 = arith.mulf %235, %238 : vector<1x128xf32>
    %c15 = arith.constant 15 : index
    %c0_105 = arith.constant 0 : index
    %240 = vector.load %arg2[%c15, %c0_105] : memref<24x128xf32, #tpu.memory_space<vmem>>, vector<1x128xf32>
    %241 = arith.mulf %227, %239 : vector<1x128xf32>
    %242 = arith.subf %240, %241 : vector<1x128xf32>
    %243 = vector.broadcast %239 : vector<1x128xf32> to vector<8x128xf32>
    %244 = arith.mulf %223, %243 : vector<8x128xf32>
    %245 = vector.broadcast %242 : vector<1x128xf32> to vector<8x128xf32>
    %246 = arith.addf %244, %245 : vector<8x128xf32>
    %cst_106 = arith.constant 0.000000e+00 : f32
    %247 = vector.broadcast %cst_106 : f32 to vector<8x128xf32>
    %248 = arith.maximumf %246, %247 : vector<8x128xf32>
    %249 = arith.truncf %248 : vector<8x128xf32> to vector<8x128xbf16>
    %c9_107 = arith.constant 9 : index
    %c0_108 = arith.constant 0 : index
    %c0_109 = arith.constant 0 : index
    %250 = vector.load %arg1[%c9_107, %c0_108, %c0_109] : memref<10x128x128xbf16, #tpu.memory_space<vmem>>, vector<1x128x128xbf16>
    %251 = vector.shape_cast %250 : vector<1x128x128xbf16> to vector<128x128xbf16>
    %cst_110 = arith.constant dense<0.000000e+00> : vector<8x128xf32>
    %252 = tpu.matmul %249, %251, %cst_110 {dimension_numbers = #tpu.dot_dimension_numbers<[1], [0], [0], [1], [0, 0, 1, 1], [], []>} : vector<8x128xbf16>, vector<128x128xbf16>, vector<8x128xf32> -> vector<8x128xf32>
    %c17 = arith.constant 17 : index
    %c0_111 = arith.constant 0 : index
    %253 = vector.load %arg2[%c17, %c0_111] : memref<24x128xf32, #tpu.memory_space<vmem>>, vector<1x128xf32>
    %254 = vector.broadcast %253 : vector<1x128xf32> to vector<8x128xf32>
    %255 = arith.addf %252, %254 : vector<8x128xf32>
    %cst_112 = arith.constant 5.000000e-01 : f32
    %256 = vector.broadcast %cst_112 : f32 to vector<8x128xf32>
    %257 = arith.mulf %256, %255 : vector<8x128xf32>
    %258 = math.tanh %257 : vector<8x128xf32>
    %cst_113 = arith.constant 5.000000e-01 : f32
    %259 = vector.broadcast %cst_113 : f32 to vector<8x128xf32>
    %260 = arith.mulf %259, %258 : vector<8x128xf32>
    %cst_114 = arith.constant 5.000000e-01 : f32
    %261 = vector.broadcast %cst_114 : f32 to vector<8x128xf32>
    %262 = arith.addf %260, %261 : vector<8x128xf32>
    %c0_115 = arith.constant 0 : index
    %c0_116 = arith.constant 0 : index
    %c0_117 = arith.constant 0 : index
    %263 = vector.load %arg3[%c0_115, %c0_116, %c0_117] : memref<2x8x128xf32, #tpu.memory_space<vmem>>, vector<1x8x128xf32>
    %264 = vector.shape_cast %263 : vector<1x8x128xf32> to vector<8x128xf32>
    %265 = vector.shape_cast %262 : vector<8x128xf32> to vector<1x8x128xf32>
    tpu.vector_store %arg3[%c0_115, %c0_116, %c0_117], %265 {strides = array<i32>} : memref<2x8x128xf32, #tpu.memory_space<vmem>>, vector<1x8x128xf32>,
    %c1_118 = arith.constant 1 : index
    %c0_119 = arith.constant 0 : index
    %c0_120 = arith.constant 0 : index
    %266 = vector.load %arg3[%c1_118, %c0_119, %c0_120] : memref<2x8x128xf32, #tpu.memory_space<vmem>>, vector<1x8x128xf32>
    %267 = vector.shape_cast %266 : vector<1x8x128xf32> to vector<8x128xf32>
    %268 = vector.shape_cast %132 : vector<8x128xf32> to vector<1x8x128xf32>
    tpu.vector_store %arg3[%c1_118, %c0_119, %c0_120], %268 {strides = array<i32>} : memref<2x8x128xf32, #tpu.memory_space<vmem>>, vector<1x8x128xf32>,
    return
  }
}

</mosaic_0001>

<bundles_post_ra>
// kernel: autoencoder_forward.1
= control target key start
LH: loop header
LB: loop body
LE: loop exit
PB: predicated region body
PF: predicated region fallthrough
CT: control target
= control target key end

     0   :  { %8 = vsyncpa [#allocation3], 0  ;;  %s1902_s12 = smov [#allocation2]   ;;  %s2117_s0 = inlined_call_operand.vmem [shape: f32[2,8,128], index: 0, kind: input, shape index: {}]   ;;  %s2118_s1 = inlined_call_operand.hbm [shape: bf16[10,128,128], index: 1, kind: input, shape index: {}]   ;;  %s2119_s2 = inlined_call_operand.vmem [shape: f32[24,128], index: 2, kind: input, shape index: {}]   ;;  %s2120_s3 = inlined_call_operand.vmem [shape: f32[2,8,128], index: 3, kind: output, shape index: {}]  }
   0x1   :  { %s16_s13 = sshll.u32 %s1902_s12, 4  ;;  %s17_s13 = int_to_ptr.vmem [resolvable:$true] %s16_s13 }
   0x2   :  { %s1888_s14 = scalar_lea.vmem %s17_s13, 10240  ;;  %p1893_p1 = scmp.lt.s32.totalorder %s17_s13, %s17_s13 }
   0x3   :  { %p1889_p0 = scmp.ne.s32.totalorder %s17_s13, %s1888_s14  ;;  %p1894_p2 = scmp.lt.s32.totalorder %s1888_s14, %s1888_s14 }
   0x5   :  { %p1895_p3 = por %p1894_p2, %p1893_p1 }
   0x7   :  { %p1896_p4 = pnand %p1895_p3, %p1889_p0 }
   0x9   :  { %1899 = shalt.err (!%p1896_p4)
}
   0xa   :  { %s1903_s15 = smov 64   ;;  %s1904_s16 = smov 4  }
   0xb   :  { %22 = dma.hbm_to_vmem [thread:$0]  %s2118_s1, 10240, %s17_s13, [#allocation3], %s1903_s15, %s1903_s15, %s1904_s16  }
   0xc   :  { %1900 = dma.done.wait [#allocation3], 10240  }
   0xd   :  { %1901 = vsyncadd [#allocation3], 4294957056  ;;  %v1905_v0 = vmov 0.0   ;;  %vm1906_vm0 = vmmov 0   ;;  %v1780_v1 = vld [vmem:[#allocation2 + $0x38] sm:$0xff]   ;;  %v1781_v2 = vld [vmem:[#allocation2 + $0x30] sm:$0xff]   ;;  %v162_v41 = vlaneseq }
   0xe   :  { %1575 = vmatprep.subr.bf16.mxu0 %v1905_v0  ;;  %1591 = vmatprep.mubr.msk.bf16.mxu0 %vm1906_vm0, %v1905_v0  ;;  %v1782_v3 = vld [vmem:[#allocation2 + $0x28] sm:$0xff]   ;;  %v1783_v4 = vld [vmem:[#allocation2 + $0x20] sm:$0xff]   ;;  %v1784_v5 = vld [vmem:[#allocation2 + $0x18] sm:$0xff]  }
   0xf   :  { %1595 = vmatprep.subr.bf16.mxu1 %v1905_v0  ;;  %1611 = vmatprep.mubr.msk.bf16.mxu1 %vm1906_vm0, %v1905_v0  ;;  %v1785_v6 = vld [vmem:[#allocation2 + $0x10] sm:$0xff]   ;;  %v1786_v7 = vld [vmem:[#allocation2 + $0x8] sm:$0xff]   ;;  %v1787_v8 = vld [vmem:[#allocation2] sm:$0xff]   ;;  %v163_v42 = vshrl.u32 %v162_v41, 7 }
  0x10   :  { %1576 = vmatpush3.bf16.msra.mxu0 %v1780_v1  ;;  %v29_v9 = vld [vmem:[%s2117_s0] sm:$0xff]  ;;  %v1788_v11 = vld [vmem:[#allocation2 + $0x78] sm:$0xff]   ;;  %v1789_v12 = vld [vmem:[#allocation2 + $0x70] sm:$0xff]  }
  0x11   :  { %1577 = vmatprep.subr.bf16.mxu0 %v1905_v0  ;;  %v32_v10 = vpack.c.bf16 %v29_v9, %v29_v9  ;;  %1596 = vmatpush3.bf16.msra.mxu1 %v1788_v11  ;;  %v1790_v13 = vld [vmem:[#allocation2 + $0x68] sm:$0xff]   ;;  %v1791_v14 = vld [vmem:[#allocation2 + $0x60] sm:$0xff]   ;;  %v1792_v15 = vld [vmem:[#allocation2 + $0x58] sm:$0xff]   ;;  %v1962_v44 = vsub.s32 0, %v163_v42 }
  0x12   :  { %1597 = vmatprep.subr.bf16.mxu1 %v1905_v0  ;;  %v1793_v16 = vld [vmem:[#allocation2 + $0x50] sm:$0xff]   ;;  %v1794_v17 = vld [vmem:[#allocation2 + $0x48] sm:$0xff]   ;;  %v1795_v18 = vld [vmem:[#allocation2 + $0x40] sm:$0xff]  }
  0x13   :  { %v155_v43 = vld [vmem:[%s2119_s2] sm:$0x1]  ;;  %v159_v47 = vld [vmem:[%s2119_s2 + $0x1] sm:$0x1]  ;;  %v1796_v56 = vld [vmem:[#allocation2 + $0xb8] sm:$0xff]  }
  0x14   :  { %1578 = vmatpush3.bf16.msra.mxu0 %v1781_v2  ;;  %v1797_v57 = vld [vmem:[#allocation2 + $0xb0] sm:$0xff]   ;;  %v1798_v58 = vld [vmem:[#allocation2 + $0xa8] sm:$0xff]   ;;  %v1799_v59 = vld [vmem:[#allocation2 + $0xa0] sm:$0xff]  }
  0x15   :  { %1579 = vmatprep.subr.bf16.mxu0 %v1905_v0  ;;  %1598 = vmatpush3.bf16.msra.mxu1 %v1789_v12  ;;  %v1800_v60 = vld [vmem:[#allocation2 + $0x98] sm:$0xff]   ;;  %v1801_v61 = vld [vmem:[#allocation2 + $0x90] sm:$0xff]   ;;  %v1802_v62 = vld [vmem:[#allocation2 + $0x88] sm:$0xff]  }
  0x16   :  { %1599 = vmatprep.subr.bf16.mxu1 %v1905_v0  ;;  %v1803_v63 = vld [vmem:[#allocation2 + $0x80] sm:$0xff]   ;;  %v1810_v41 = vld [vmem:[#allocation2 + $0xc8] sm:$0xff]  }
  0x17   :  { %v1811_v42 = vld [vmem:[#allocation2 + $0xc0] sm:$0xff]  }
  0x18   :  { %1580 = vmatpush3.bf16.msra.mxu0 %v1782_v3 }
  0x19   :  { %1581 = vmatprep.subr.bf16.mxu0 %v1905_v0  ;;  %1600 = vmatpush3.bf16.msra.mxu1 %v1790_v13 }
  0x1a   :  { %1601 = vmatprep.subr.bf16.mxu1 %v1905_v0 }
  0x1c   :  { %1582 = vmatpush3.bf16.msra.mxu0 %v1783_v4 }
  0x1d   :  { %1583 = vmatprep.subr.bf16.mxu0 %v1905_v0  ;;  %1602 = vmatpush3.bf16.msra.mxu1 %v1791_v14 }
  0x1e   :  { %1603 = vmatprep.subr.bf16.mxu1 %v1905_v0 }
  0x20   :  { %1584 = vmatpush3.bf16.msra.mxu0 %v1784_v5 }
  0x21   :  { %1585 = vmatprep.subr.bf16.mxu0 %v1905_v0  ;;  %1604 = vmatpush3.bf16.msra.mxu1 %v1792_v15 }
  0x22   :  { %1605 = vmatprep.subr.bf16.mxu1 %v1905_v0 }
  0x24   :  { %1586 = vmatpush3.bf16.msra.mxu0 %v1785_v6 }
  0x25   :  { %1587 = vmatprep.subr.bf16.mxu0 %v1905_v0  ;;  %1606 = vmatpush3.bf16.msra.mxu1 %v1793_v16 }
  0x26   :  { %1607 = vmatprep.subr.bf16.mxu1 %v1905_v0 }
  0x28   :  { %1588 = vmatpush3.bf16.msra.mxu0 %v1786_v7 }
  0x29   :  { %1589 = vmatprep.subr.bf16.mxu0 %v1905_v0  ;;  %1608 = vmatpush3.bf16.msra.mxu1 %v1794_v17 }
  0x2a   :  { %1609 = vmatprep.subr.bf16.mxu1 %v1905_v0 }
  0x2c   :  { %1590 = vmatpush3.bf16.msra.mxu0 %v1787_v8 }
  0x2d   :  { %1615 = vmatprep.subr.bf16.mxu0 %v1905_v0  ;;  %1610 = vmatpush3.bf16.msra.mxu1 %v1795_v18 }
  0x2e   :  { %1635 = vmatprep.subr.bf16.mxu1 %v1905_v0 }
  0x2f   :  { %1592 = vmatmul.mubr.bf16.vlgmr.msra.gmra.mxu0 %v32_v10 }
  0x30   :  { %1631 = vmatprep.mubr.msk.bf16.mxu0 %vm1906_vm0, %v1905_v0  ;;  %1616 = vmatpush3.bf16.msra.mxu0 %v1796_v56 }
  0x31   :  { %1617 = vmatprep.subr.bf16.mxu0 %v1905_v0 }
  0x34   :  { %1618 = vmatpush3.bf16.msra.mxu0 %v1797_v57 }
  0x35   :  { %1619 = vmatprep.subr.bf16.mxu0 %v1905_v0 }
  0x38   :  { %1620 = vmatpush3.bf16.msra.mxu0 %v1798_v58 }
  0x39   :  { %1621 = vmatprep.subr.bf16.mxu0 %v1905_v0 }
  0x3c   :  { %1622 = vmatpush3.bf16.msra.mxu0 %v1799_v59 }
  0x3d   :  { %1623 = vmatprep.subr.bf16.mxu0 %v1905_v0 }
  0x40   :  { %1624 = vmatpush3.bf16.msra.mxu0 %v1800_v60 }
  0x41   :  { %1625 = vmatprep.subr.bf16.mxu0 %v1905_v0 }
  0x44   :  { %1626 = vmatpush3.bf16.msra.mxu0 %v1801_v61 }
  0x45   :  { %1627 = vmatprep.subr.bf16.mxu0 %v1905_v0 }
  0x48   :  { %1628 = vmatpush3.bf16.msra.mxu0 %v1802_v62 }
  0x49   :  { %1629 = vmatprep.subr.bf16.mxu0 %v1905_v0 }
  0x4c   :  { %1630 = vmatpush3.bf16.msra.mxu0 %v1803_v63 }
  0x4d   :  { %1655 = vmatprep.subr.bf16.mxu0 %v1905_v0 }
  0xef   :  { %v131_v19 = vpop.f32.mrf.mxu0 }
  0xf0   :  { %v137_v20 = vrot.slane %v131_v19, 4  ;;  %v145_v21 = vmul.f32 %v131_v19, %v131_v19 }
  0xf1   :  { %v1593_v22 = vpop.f32.mrf.mxu0 }
  0xf2   :  { %v138_v23 = vadd.f32 %v137_v20, %v131_v19  ;;  %v146_v24 = vrot.slane %v145_v21, 4 }
  0xf3   :  { %v134_v25 = vpop.f32.mrf.mxu0 }
  0xf4   :  { %v139_v26 = vrot.slane %v138_v23, 2  ;;  %v147_v27 = vadd.f32 %v146_v24, %v145_v21 }
  0xf5   :  { %v1594_v28 = vpop.f32.mrf.mxu0 }
  0xf6   :  { %v140_v29 = vadd.f32 %v139_v26, %v138_v23  ;;  %v148_v30 = vrot.slane %v147_v27, 2  ;;  %v296_v23 = vld [vmem:[%s2119_s2 + $0x2] sm:$0x1]  ;;  %v300_v26 = vld [vmem:[%s2119_s2 + $0x3] sm:$0x1] }
  0xf8   :  { %v141_v31 = vrot.slane %v140_v29, 1  ;;  %v149_v32 = vadd.f32 %v148_v30, %v147_v27 }
  0xfa   :  { %v142_v33 = vadd.f32 %v141_v31, %v140_v29  ;;  %v150_v34 = vrot.slane %v149_v32, 1 }
  0xfc   :  { %v144_v35 = vmul.f32 0.125, %v142_v33  ;;  %v151_v36 = vadd.f32 %v150_v34, %v149_v32 }
  0xfe   :  { %v152_v37 = vmul.f32 0.125, %v151_v36  ;;  %v153_v38 = vmul.f32 %v144_v35, %v144_v35  ;;  %v1805_v36 = vld [vmem:[#allocation2 + $0xf0] sm:$0xff]  }
 0x100   :  { %v154_v39 = vsub.f32 %v152_v37, %v153_v38  ;;  %v1806_v37 = vld [vmem:[#allocation2 + $0xe8] sm:$0xff]   ;;  %v1807_v38 = vld [vmem:[#allocation2 + $0xe0] sm:$0xff]  }
 0x102   :  { %v156_v40 = vadd.f32 1e-05, %v154_v39  ;;  %v1808_v39 = vld [vmem:[#allocation2 + $0xd8] sm:$0xff]  }
 0x104   :  { %1860 = vrsqrt.f32 %v156_v40  ;;  %v1809_v40 = vld [vmem:[#allocation2 + $0xd0] sm:$0xff]  }
 0x111   :  { %v1861_v45 = vpop.eup %1860 }
 0x112   :  { %v158_v46 = vmul.f32 %v1861_v45, %v155_v43 }
 0x114   :  { %v165_v48 = vrot.slane %v158_v46, %v1962_v44  ;;  %v160_v49 = vmul.f32 %v158_v46, %v144_v35  ;;  %v1804_v35 = vld [vmem:[#allocation2 + $0xf8] sm:$0xff]  }
 0x116   :  { %v161_v50 = vsub.f32 %v159_v47, %v160_v49  ;;  %v166_v51 = vmul.f32 %v165_v48, %v131_v19 }
 0x118   :  { %v170_v52 = vrot.slane %v161_v50, %v1962_v44 }
 0x11a   :  { %v171_v53 = vadd.f32 %v170_v52, %v166_v51 }
 0x11c   :  { %v172_v54 = vmax.f32 %v171_v53, 0.0 }
 0x11e   :  { %v173_v55 = vpack.c.bf16 %v172_v54, %v172_v54 }
 0x120   :  { %1612 = vmatmul.mubr.bf16.vlgmr.msra.gmra.mxu1 %v173_v55 }
 0x121   :  { %1651 = vmatprep.mubr.msk.bf16.mxu1 %vm1906_vm0, %v1905_v0  ;;  %1636 = vmatpush3.bf16.msra.mxu1 %v1804_v35 }
 0x122   :  { %1637 = vmatprep.subr.bf16.mxu1 %v1905_v0 }
 0x125   :  { %1638 = vmatpush3.bf16.msra.mxu1 %v1805_v36 }
 0x126   :  { %1639 = vmatprep.subr.bf16.mxu1 %v1905_v0 }
 0x129   :  { %1640 = vmatpush3.bf16.msra.mxu1 %v1806_v37 }
 0x12a   :  { %1641 = vmatprep.subr.bf16.mxu1 %v1905_v0 }
 0x12d   :  { %1642 = vmatpush3.bf16.msra.mxu1 %v1807_v38 }
 0x12e   :  { %1643 = vmatprep.subr.bf16.mxu1 %v1905_v0 }
 0x131   :  { %1644 = vmatpush3.bf16.msra.mxu1 %v1808_v39 }
 0x132   :  { %1645 = vmatprep.subr.bf16.mxu1 %v1905_v0 }
 0x135   :  { %1646 = vmatpush3.bf16.msra.mxu1 %v1809_v40 }
 0x136   :  { %1647 = vmatprep.subr.bf16.mxu1 %v1905_v0 }
 0x139   :  { %1648 = vmatpush3.bf16.msra.mxu1 %v1810_v41 }
 0x13a   :  { %1649 = vmatprep.subr.bf16.mxu1 %v1905_v0 }
 0x13d   :  { %1650 = vmatpush3.bf16.msra.mxu1 %v1811_v42 }
 0x13e   :  { %1675 = vmatprep.subr.bf16.mxu1 %v1905_v0 }
 0x1e0   :  { %v273_v1 = vpop.f32.mrf.mxu1 }
 0x1e1   :  { %v279_v2 = vrot.slane %v273_v1, 4  ;;  %v286_v3 = vmul.f32 %v273_v1, %v273_v1 }
 0x1e2   :  { %v1613_v4 = vpop.f32.mrf.mxu1 }
 0x1e3   :  { %v280_v5 = vadd.f32 %v279_v2, %v273_v1  ;;  %v287_v6 = vrot.slane %v286_v3, 4 }
 0x1e4   :  { %v276_v7 = vpop.f32.mrf.mxu1 }
 0x1e5   :  { %v281_v8 = vrot.slane %v280_v5, 2  ;;  %v288_v9 = vadd.f32 %v287_v6, %v286_v3  ;;  %v437_v3 = vld [vmem:[%s2119_s2 + $0x4] sm:$0x1]  ;;  %v441_v6 = vld [vmem:[%s2119_s2 + $0x5] sm:$0x1] }
 0x1e6   :  { %v1614_v10 = vpop.f32.mrf.mxu1 }
 0x1e7   :  { %v282_v11 = vadd.f32 %v281_v8, %v280_v5  ;;  %v289_v12 = vrot.slane %v288_v9, 2 }
 0x1e9   :  { %v283_v13 = vrot.slane %v282_v11, 1  ;;  %v290_v14 = vadd.f32 %v289_v12, %v288_v9 }
 0x1eb   :  { %v284_v15 = vadd.f32 %v283_v13, %v282_v11  ;;  %v291_v16 = vrot.slane %v290_v14, 1 }
 0x1ed   :  { %v285_v17 = vmul.f32 0.125, %v284_v15  ;;  %v292_v18 = vadd.f32 %v291_v16, %v290_v14  ;;  %v1812_v15 = vld [vmem:[#allocation2 + $0x138] sm:$0xff]   ;;  %v1813_v16 = vld [vmem:[#allocation2 + $0x130] sm:$0xff]  }
 0x1ef   :  { %v293_v19 = vmul.f32 0.125, %v292_v18  ;;  %v294_v20 = vmul.f32 %v285_v17, %v285_v17  ;;  %v1815_v18 = vld [vmem:[#allocation2 + $0x120] sm:$0xff]  }
 0x1f1   :  { %v295_v21 = vsub.f32 %v293_v19, %v294_v20  ;;  %v1816_v19 = vld [vmem:[#allocation2 + $0x118] sm:$0xff]   ;;  %v1817_v20 = vld [vmem:[#allocation2 + $0x110] sm:$0xff]  }
 0x1f3   :  { %v297_v22 = vadd.f32 1e-05, %v295_v21  ;;  %v1818_v21 = vld [vmem:[#allocation2 + $0x108] sm:$0xff]  }
 0x1f5   :  { %1862 = vrsqrt.f32 %v297_v22  ;;  %v1819_v22 = vld [vmem:[#allocation2 + $0x100] sm:$0xff]  }
 0x202   :  { %v1863_v24 = vpop.eup %1862 }
 0x203   :  { %v299_v25 = vmul.f32 %v1863_v24, %v296_v23 }
 0x205   :  { %v301_v27 = vmul.f32 %v299_v25, %v285_v17  ;;  %v306_v28 = vrot.slane %v299_v25, %v1962_v44  ;;  %v1814_v17 = vld [vmem:[#allocation2 + $0x128] sm:$0xff]  }
 0x207   :  { %v302_v29 = vsub.f32 %v300_v26, %v301_v27  ;;  %v307_v30 = vmul.f32 %v306_v28, %v273_v1 }
 0x209   :  { %v311_v31 = vrot.slane %v302_v29, %v1962_v44 }
 0x20b   :  { %v312_v32 = vadd.f32 %v311_v31, %v307_v30 }
 0x20d   :  { %v313_v33 = vmax.f32 %v312_v32, 0.0 }
 0x20f   :  { %v314_v34 = vpack.c.bf16 %v313_v33, %v313_v33 }
 0x211   :  { %1632 = vmatmul.mubr.bf16.vlgmr.msra.gmra.mxu0 %v314_v34 }
 0x212   :  { %1671 = vmatprep.mubr.msk.bf16.mxu0 %vm1906_vm0, %v1905_v0  ;;  %1656 = vmatpush3.bf16.msra.mxu0 %v1812_v15 }
 0x213   :  { %1657 = vmatprep.subr.bf16.mxu0 %v1905_v0 }
 0x216   :  { %1658 = vmatpush3.bf16.msra.mxu0 %v1813_v16 }
 0x217   :  { %1659 = vmatprep.subr.bf16.mxu0 %v1905_v0 }
 0x21a   :  { %1660 = vmatpush3.bf16.msra.mxu0 %v1814_v17  ;;  %v1828_v17 = vld [vmem:[#allocation2 + $0x1b8] sm:$0xff]  }
 0x21b   :  { %1661 = vmatprep.subr.bf16.mxu0 %v1905_v0 }
 0x21e   :  { %1662 = vmatpush3.bf16.msra.mxu0 %v1815_v18  ;;  %v1829_v18 = vld [vmem:[#allocation2 + $0x1b0] sm:$0xff]  }
 0x21f   :  { %1663 = vmatprep.subr.bf16.mxu0 %v1905_v0 }
 0x222   :  { %1664 = vmatpush3.bf16.msra.mxu0 %v1816_v19  ;;  %v1830_v19 = vld [vmem:[#allocation2 + $0x1a8] sm:$0xff]  }
 0x223   :  { %1665 = vmatprep.subr.bf16.mxu0 %v1905_v0 }
 0x226   :  { %1666 = vmatpush3.bf16.msra.mxu0 %v1817_v20  ;;  %v1831_v20 = vld [vmem:[#allocation2 + $0x1a0] sm:$0xff]  }
 0x227   :  { %1667 = vmatprep.subr.bf16.mxu0 %v1905_v0 }
 0x22a   :  { %1668 = vmatpush3.bf16.msra.mxu0 %v1818_v21  ;;  %v1832_v21 = vld [vmem:[#allocation2 + $0x198] sm:$0xff]  }
 0x22b   :  { %1669 = vmatprep.subr.bf16.mxu0 %v1905_v0 }
 0x22e   :  { %1670 = vmatpush3.bf16.msra.mxu0 %v1819_v22  ;;  %v1833_v22 = vld [vmem:[#allocation2 + $0x190] sm:$0xff]  }
 0x22f   :  { %1695 = vmatprep.subr.bf16.mxu0 %v1905_v0 }
 0x2d1   :  { %v414_v43 = vpop.f32.mrf.mxu0 }
 0x2d2   :  { %v420_v45 = vrot.slane %v414_v43, 4  ;;  %v427_v46 = vmul.f32 %v414_v43, %v414_v43 }
 0x2d3   :  { %v1633_v47 = vpop.f32.mrf.mxu0 }
 0x2d4   :  { %v421_v48 = vadd.f32 %v420_v45, %v414_v43  ;;  %v428_v49 = vrot.slane %v427_v46, 4 }
 0x2d5   :  { %v417_v50 = vpop.f32.mrf.mxu0 }
 0x2d6   :  { %v422_v51 = vrot.slane %v421_v48, 2  ;;  %v429_v52 = vadd.f32 %v428_v49, %v427_v46  ;;  %v578_v46 = vld [vmem:[%s2119_s2 + $0x6] sm:$0x1]  ;;  %v582_v49 = vld [vmem:[%s2119_s2 + $0x7] sm:$0x1] }
 0x2d7   :  { %v1634_v53 = vpop.f32.mrf.mxu0 }
 0x2d8   :  { %v423_v54 = vadd.f32 %v422_v51, %v421_v48  ;;  %v430_v55 = vrot.slane %v429_v52, 2 }
 0x2da   :  { %v424_v56 = vrot.slane %v423_v54, 1  ;;  %v431_v57 = vadd.f32 %v430_v55, %v429_v52 }
 0x2dc   :  { %v425_v58 = vadd.f32 %v424_v56, %v423_v54  ;;  %v432_v59 = vrot.slane %v431_v57, 1 }
 0x2de   :  { %v426_v60 = vmul.f32 0.125, %v425_v58  ;;  %v433_v61 = vadd.f32 %v432_v59, %v431_v57  ;;  %v1820_v58 = vld [vmem:[#allocation2 + $0x178] sm:$0xff]   ;;  %v1821_v59 = vld [vmem:[#allocation2 + $0x170] sm:$0xff]  }
 0x2e0   :  { %v434_v62 = vmul.f32 0.125, %v433_v61  ;;  %v435_v63 = vmul.f32 %v426_v60, %v426_v60  ;;  %v1823_v61 = vld [vmem:[#allocation2 + $0x160] sm:$0xff]  }
 0x2e2   :  { %v436_v1 = vsub.f32 %v434_v62, %v435_v63  ;;  %v1824_v62 = vld [vmem:[#allocation2 + $0x158] sm:$0xff]   ;;  %v1434_v63 = vld [vmem:[%s2119_s2 + $0x10] ss:$0 sm:$0xff] }
 0x2e4   :  { %v438_v2 = vadd.f32 1e-05, %v436_v1  ;;  %v1825_v1 = vld [vmem:[#allocation2 + $0x150] sm:$0xff]  }
 0x2e6   :  { %1864 = vrsqrt.f32 %v438_v2 }
 0x2f3   :  { %v1865_v4 = vpop.eup %1864 }
 0x2f4   :  { %v440_v5 = vmul.f32 %v1865_v4, %v437_v3 }
 0x2f6   :  { %v442_v7 = vmul.f32 %v440_v5, %v426_v60  ;;  %v447_v8 = vrot.slane %v440_v5, %v1962_v44  ;;  %v1822_v60 = vld [vmem:[#allocation2 + $0x168] sm:$0xff]  }
 0x2f7   :  { %v1826_v5 = vld [vmem:[#allocation2 + $0x148] sm:$0xff]  }
 0x2f8   :  { %v443_v9 = vsub.f32 %v441_v6, %v442_v7  ;;  %v448_v10 = vmul.f32 %v447_v8, %v414_v43  ;;  %v1827_v8 = vld [vmem:[#allocation2 + $0x140] sm:$0xff]  }
 0x2fa   :  { %v452_v11 = vrot.slane %v443_v9, %v1962_v44 }
 0x2fc   :  { %v453_v12 = vadd.f32 %v452_v11, %v448_v10 }
 0x2fe   :  { %v454_v13 = vmax.f32 %v453_v12, 0.0  ;;  %v1401_v12 = vld [vmem:[%s2117_s0 + $0x8] sm:$0xff] }
 0x300   :  { %v455_v14 = vpack.c.bf16 %v454_v13, %v454_v13 }
 0x302   :  { %1652 = vmatmul.mubr.bf16.vlgmr.msra.gmra.mxu1 %v455_v14 }
 0x303   :  { %1691 = vmatprep.mubr.msk.bf16.mxu1 %vm1906_vm0, %v1905_v0  ;;  %1676 = vmatpush3.bf16.msra.mxu1 %v1820_v58 }
 0x304   :  { %1677 = vmatprep.subr.bf16.mxu1 %v1905_v0 }
 0x307   :  { %1678 = vmatpush3.bf16.msra.mxu1 %v1821_v59 }
 0x308   :  { %1679 = vmatprep.subr.bf16.mxu1 %v1905_v0 }
 0x30b   :  { %1680 = vmatpush3.bf16.msra.mxu1 %v1822_v60  ;;  %v1836_v60 = vld [vmem:[#allocation2 + $0x1f8] sm:$0xff]  }
 0x30c   :  { %1681 = vmatprep.subr.bf16.mxu1 %v1905_v0 }
 0x30f   :  { %1682 = vmatpush3.bf16.msra.mxu1 %v1823_v61  ;;  %v1837_v61 = vld [vmem:[#allocation2 + $0x1f0] sm:$0xff]  }
 0x310   :  { %1683 = vmatprep.subr.bf16.mxu1 %v1905_v0 }
 0x313   :  { %1684 = vmatpush3.bf16.msra.mxu1 %v1824_v62  ;;  %v1838_v62 = vld [vmem:[#allocation2 + $0x1e8] sm:$0xff]  }
 0x314   :  { %1685 = vmatprep.subr.bf16.mxu1 %v1905_v0 }
 0x317   :  { %1686 = vmatpush3.bf16.msra.mxu1 %v1825_v1  ;;  %v1840_v1 = vld [vmem:[#allocation2 + $0x1d8] sm:$0xff]  }
 0x318   :  { %1687 = vmatprep.subr.bf16.mxu1 %v1905_v0 }
 0x31b   :  { %1688 = vmatpush3.bf16.msra.mxu1 %v1826_v5 }
 0x31c   :  { %1689 = vmatprep.subr.bf16.mxu1 %v1905_v0 }
 0x31f   :  { %1690 = vmatpush3.bf16.msra.mxu1 %v1827_v8 }
 0x320   :  { %1715 = vmatprep.subr.bf16.mxu1 %v1905_v0 }
 0x3c2   :  { %v555_v23 = vpop.f32.mrf.mxu1 }
 0x3c3   :  { %v561_v24 = vrot.slane %v555_v23, 4  ;;  %v568_v25 = vmul.f32 %v555_v23, %v555_v23 }
 0x3c4   :  { %v1653_v26 = vpop.f32.mrf.mxu1 }
 0x3c5   :  { %v562_v27 = vadd.f32 %v561_v24, %v555_v23  ;;  %v569_v28 = vrot.slane %v568_v25, 4  ;;  %v1835_v24 = vld [vmem:[#allocation2 + $0x180] sm:$0xff]  }
 0x3c6   :  { %v558_v29 = vpop.f32.mrf.mxu1 }
 0x3c7   :  { %v563_v30 = vrot.slane %v562_v27, 2  ;;  %v570_v31 = vadd.f32 %v569_v28, %v568_v25 }
 0x3c8   :  { %v1654_v32 = vpop.f32.mrf.mxu1 }
 0x3c9   :  { %v564_v33 = vadd.f32 %v563_v30, %v562_v27  ;;  %v571_v34 = vrot.slane %v570_v31, 2 }
 0x3cb   :  { %v565_v35 = vrot.slane %v564_v33, 1  ;;  %v572_v36 = vadd.f32 %v571_v34, %v570_v31 }
 0x3cd   :  { %v566_v37 = vadd.f32 %v565_v35, %v564_v33  ;;  %v573_v38 = vrot.slane %v572_v36, 1 }
 0x3cf   :  { %v567_v39 = vmul.f32 0.125, %v566_v37  ;;  %v574_v40 = vadd.f32 %v573_v38, %v572_v36 }
 0x3d1   :  { %v575_v41 = vmul.f32 0.125, %v574_v40  ;;  %v576_v42 = vmul.f32 %v567_v39, %v567_v39 }
 0x3d3   :  { %v577_v43 = vsub.f32 %v575_v41, %v576_v42 }
 0x3d5   :  { %v579_v45 = vadd.f32 1e-05, %v577_v43 }
 0x3d7   :  { %1866 = vrsqrt.f32 %v579_v45 }
 0x3e4   :  { %v1867_v47 = vpop.eup %1866 }
 0x3e5   :  { %v581_v48 = vmul.f32 %v1867_v47, %v578_v46 }
 0x3e7   :  { %v583_v50 = vmul.f32 %v581_v48, %v567_v39  ;;  %v588_v51 = vrot.slane %v581_v48, %v1962_v44  ;;  %v837_v48 = vld [vmem:[%s2119_s2 + $0x8] sm:$0x1] }
 0x3e9   :  { %v584_v52 = vsub.f32 %v582_v49, %v583_v50  ;;  %v589_v53 = vmul.f32 %v588_v51, %v555_v23  ;;  %v1834_v23 = vld [vmem:[#allocation2 + $0x188] sm:$0xff]  }
 0x3ea   :  { %v841_v51 = vld [vmem:[%s2119_s2 + $0x9] sm:$0x1] }
 0x3eb   :  { %v593_v54 = vrot.slane %v584_v52, %v1962_v44 }
 0x3ed   :  { %v594_v55 = vadd.f32 %v593_v54, %v589_v53 }
 0x3ef   :  { %v595_v56 = vmax.f32 %v594_v55, 0.0 }
 0x3f1   :  { %v596_v57 = vpack.c.bf16 %v595_v56, %v595_v56 }
 0x3f3   :  { %1672 = vmatmul.mubr.bf16.vlgmr.msra.gmra.mxu0 %v596_v57 }
 0x3f4   :  { %1711 = vmatprep.mubr.msk.bf16.mxu0 %vm1906_vm0, %v1905_v0  ;;  %1696 = vmatpush3.bf16.msra.mxu0 %v1828_v17 }
 0x3f5   :  { %1697 = vmatprep.subr.bf16.mxu0 %v1905_v0 }
 0x3f8   :  { %1698 = vmatpush3.bf16.msra.mxu0 %v1829_v18 }
 0x3f9   :  { %1699 = vmatprep.subr.bf16.mxu0 %v1905_v0 }
 0x3fc   :  { %1700 = vmatpush3.bf16.msra.mxu0 %v1830_v19 }
 0x3fd   :  { %1701 = vmatprep.subr.bf16.mxu0 %v1905_v0 }
 0x400   :  { %1702 = vmatpush3.bf16.msra.mxu0 %v1831_v20 }
 0x401   :  { %1703 = vmatprep.subr.bf16.mxu0 %v1905_v0 }
 0x404   :  { %1704 = vmatpush3.bf16.msra.mxu0 %v1832_v21 }
 0x405   :  { %1705 = vmatprep.subr.bf16.mxu0 %v1905_v0 }
 0x408   :  { %1706 = vmatpush3.bf16.msra.mxu0 %v1833_v22 }
 0x409   :  { %1707 = vmatprep.subr.bf16.mxu0 %v1905_v0 }
 0x40c   :  { %1708 = vmatpush3.bf16.msra.mxu0 %v1834_v23 }
 0x40d   :  { %1709 = vmatprep.subr.bf16.mxu0 %v1905_v0 }
 0x410   :  { %1710 = vmatpush3.bf16.msra.mxu0 %v1835_v24 }
 0x411   :  { %1735 = vmatprep.subr.bf16.mxu0 %v1905_v0 }
 0x4b3   :  { %v701_v2 = vpop.f32.mrf.mxu0 }
 0x4b4   :  { %v702_v3 = vadd.f32 %v1434_v63, %v701_v2  ;;  %v1839_v63 = vld [vmem:[#allocation2 + $0x1e0] sm:$0xff]   ;;  %v1841_v2 = vld [vmem:[#allocation2 + $0x1d0] sm:$0xff]  }
 0x4b5   :  { %v1673_v4 = vpop.f32.mrf.mxu0 }
 0x4b6   :  { %707 = vrot.lane.b32.xlu0 %v702_v3, %s1903_s15  ;;  %v1843_v4 = vld [vmem:[#allocation2 + $0x1c0] sm:$0xff]  }
 0x4b7   :  { %v704_v6 = vpop.f32.mrf.mxu0 }
 0x4b9   :  { %v1674_v7 = vpop.f32.mrf.mxu0 }
 0x528   :  { %v708_v9 = vpop.permute.xlu0 %707 }
 0x529   :  { %v709_v10 = vmul.f32 0.5, %v708_v9 }
 0x52b   :  { %v710_v11 = vmul.f32 1.442695, %v709_v10 }
 0x52d   :  { %1868 = vpow2.f32 %v710_v11 }
 0x53a   :  { %v1869_v13 = vpop.eup %1868 }
 0x53b   :  { %v712_v14 = vmul.f32 %v1869_v13, %v1401_v12 }
 0x53d   :  { %v713_v15 = vadd.f32 %v712_v14, %v702_v3  ;;  %v1842_v3 = vld [vmem:[#allocation2 + $0x1c8] sm:$0xff]  }
 0x53f   :  { %v714_v16 = vpack.c.bf16 %v713_v15, %v713_v15  ;;  %1484 = vst [vmem:[%s2120_s3 + $0x8] sm:$0xff] %v713_v15 }
 0x541   :  { %1692 = vmatmul.mubr.bf16.vlgmr.msra.gmra.mxu1 %v714_v16 }
 0x542   :  { %1731 = vmatprep.mubr.msk.bf16.mxu1 %vm1906_vm0, %v1905_v0  ;;  %1716 = vmatpush3.bf16.msra.mxu1 %v1836_v60 }
 0x543   :  { %1717 = vmatprep.subr.bf16.mxu1 %v1905_v0 }
 0x546   :  { %1718 = vmatpush3.bf16.msra.mxu1 %v1837_v61 }
 0x547   :  { %1719 = vmatprep.subr.bf16.mxu1 %v1905_v0 }
 0x54a   :  { %1720 = vmatpush3.bf16.msra.mxu1 %v1838_v62 }
 0x54b   :  { %1721 = vmatprep.subr.bf16.mxu1 %v1905_v0 }
 0x54e   :  { %1722 = vmatpush3.bf16.msra.mxu1 %v1839_v63 }
 0x54f   :  { %1723 = vmatprep.subr.bf16.mxu1 %v1905_v0 }
 0x552   :  { %1724 = vmatpush3.bf16.msra.mxu1 %v1840_v1 }
 0x553   :  { %1725 = vmatprep.subr.bf16.mxu1 %v1905_v0 }
 0x556   :  { %1726 = vmatpush3.bf16.msra.mxu1 %v1841_v2 }
 0x557   :  { %1727 = vmatprep.subr.bf16.mxu1 %v1905_v0 }
 0x55a   :  { %1728 = vmatpush3.bf16.msra.mxu1 %v1842_v3 }
 0x55b   :  { %1729 = vmatprep.subr.bf16.mxu1 %v1905_v0 }
 0x55e   :  { %1730 = vmatpush3.bf16.msra.mxu1 %v1843_v4 }
 0x55f   :  { %1755 = vmatprep.subr.bf16.mxu1 %v1905_v0 }
 0x601   :  { %v814_v25 = vpop.f32.mrf.mxu1 }
 0x602   :  { %v820_v26 = vrot.slane %v814_v25, 4  ;;  %v827_v27 = vmul.f32 %v814_v25, %v814_v25 }
 0x603   :  { %v1693_v28 = vpop.f32.mrf.mxu1 }
 0x604   :  { %v821_v29 = vadd.f32 %v820_v26, %v814_v25  ;;  %v828_v30 = vrot.slane %v827_v27, 4 }
 0x605   :  { %v817_v31 = vpop.f32.mrf.mxu1 }
 0x606   :  { %v822_v32 = vrot.slane %v821_v29, 2  ;;  %v829_v33 = vadd.f32 %v828_v30, %v827_v27  ;;  %v978_v27 = vld [vmem:[%s2119_s2 + $0xa] sm:$0x1]  ;;  %v982_v30 = vld [vmem:[%s2119_s2 + $0xb] sm:$0x1] }
 0x607   :  { %v1694_v34 = vpop.f32.mrf.mxu1 }
 0x608   :  { %v823_v35 = vadd.f32 %v822_v32, %v821_v29  ;;  %v830_v36 = vrot.slane %v829_v33, 2 }
 0x60a   :  { %v824_v37 = vrot.slane %v823_v35, 1  ;;  %v831_v38 = vadd.f32 %v830_v36, %v829_v33 }
 0x60c   :  { %v825_v39 = vadd.f32 %v824_v37, %v823_v35  ;;  %v832_v40 = vrot.slane %v831_v38, 1 }
 0x60e   :  { %v826_v41 = vmul.f32 0.125, %v825_v39  ;;  %v833_v42 = vadd.f32 %v832_v40, %v831_v38  ;;  %v1844_v39 = vld [vmem:[#allocation2 + $0x238] sm:$0xff]   ;;  %v1845_v40 = vld [vmem:[#allocation2 + $0x230] sm:$0xff]  }
 0x610   :  { %v834_v43 = vmul.f32 0.125, %v833_v42  ;;  %v835_v45 = vmul.f32 %v826_v41, %v826_v41  ;;  %v1847_v42 = vld [vmem:[#allocation2 + $0x220] sm:$0xff]  }
 0x612   :  { %v836_v46 = vsub.f32 %v834_v43, %v835_v45  ;;  %v1848_v43 = vld [vmem:[#allocation2 + $0x218] sm:$0xff]   ;;  %v1849_v45 = vld [vmem:[#allocation2 + $0x210] sm:$0xff]  }
 0x614   :  { %v838_v47 = vadd.f32 1e-05, %v836_v46  ;;  %v1850_v46 = vld [vmem:[#allocation2 + $0x208] sm:$0xff]  }
 0x616   :  { %1870 = vrsqrt.f32 %v838_v47  ;;  %v1851_v47 = vld [vmem:[#allocation2 + $0x200] sm:$0xff]  }
 0x623   :  { %v1871_v49 = vpop.eup %1870 }
 0x624   :  { %v840_v50 = vmul.f32 %v1871_v49, %v837_v48 }
 0x626   :  { %v842_v52 = vmul.f32 %v840_v50, %v826_v41  ;;  %v847_v53 = vrot.slane %v840_v50, %v1962_v44  ;;  %v1846_v41 = vld [vmem:[#allocation2 + $0x228] sm:$0xff]  }
 0x628   :  { %v843_v54 = vsub.f32 %v841_v51, %v842_v52  ;;  %v848_v55 = vmul.f32 %v847_v53, %v814_v25 }
 0x62a   :  { %v852_v56 = vrot.slane %v843_v54, %v1962_v44 }
 0x62c   :  { %v853_v57 = vadd.f32 %v852_v56, %v848_v55 }
 0x62e   :  { %v854_v58 = vmax.f32 %v853_v57, 0.0 }
 0x630   :  { %v855_v59 = vpack.c.bf16 %v854_v58, %v854_v58 }
 0x632   :  { %1712 = vmatmul.mubr.bf16.vlgmr.msra.gmra.mxu0 %v855_v59 }
 0x633   :  { %1751 = vmatprep.mubr.msk.bf16.mxu0 %vm1906_vm0, %v1905_v0  ;;  %1736 = vmatpush3.bf16.msra.mxu0 %v1844_v39 }
 0x634   :  { %1737 = vmatprep.subr.bf16.mxu0 %v1905_v0 }
 0x637   :  { %1738 = vmatpush3.bf16.msra.mxu0 %v1845_v40 }
 0x638   :  { %1739 = vmatprep.subr.bf16.mxu0 %v1905_v0 }
 0x63b   :  { %1740 = vmatpush3.bf16.msra.mxu0 %v1846_v41 }
 0x63c   :  { %1741 = vmatprep.subr.bf16.mxu0 %v1905_v0 }
 0x63f   :  { %1742 = vmatpush3.bf16.msra.mxu0 %v1847_v42 }
 0x640   :  { %1743 = vmatprep.subr.bf16.mxu0 %v1905_v0 }
 0x643   :  { %1744 = vmatpush3.bf16.msra.mxu0 %v1848_v43 }
 0x644   :  { %1745 = vmatprep.subr.bf16.mxu0 %v1905_v0 }
 0x647   :  { %1746 = vmatpush3.bf16.msra.mxu0 %v1849_v45 }
 0x648   :  { %1747 = vmatprep.subr.bf16.mxu0 %v1905_v0 }
 0x64b   :  { %1748 = vmatpush3.bf16.msra.mxu0 %v1850_v46 }
 0x64c   :  { %1749 = vmatprep.subr.bf16.mxu0 %v1905_v0 }
 0x64f   :  { %1750 = vmatpush3.bf16.msra.mxu0 %v1851_v47 }
 0x6f2   :  { %v955_v5 = vpop.f32.mrf.mxu0 }
 0x6f3   :  { %v961_v6 = vrot.slane %v955_v5, 4  ;;  %v968_v7 = vmul.f32 %v955_v5, %v955_v5 }
 0x6f4   :  { %v1713_v8 = vpop.f32.mrf.mxu0 }
 0x6f5   :  { %v962_v9 = vadd.f32 %v961_v6, %v955_v5  ;;  %v969_v10 = vrot.slane %v968_v7, 4 }
 0x6f6   :  { %v958_v11 = vpop.f32.mrf.mxu0 }
 0x6f7   :  { %v963_v12 = vrot.slane %v962_v9, 2  ;;  %v970_v13 = vadd.f32 %v969_v10, %v968_v7  ;;  %v1119_v7 = vld [vmem:[%s2119_s2 + $0xc] sm:$0x1]  ;;  %v1123_v10 = vld [vmem:[%s2119_s2 + $0xd] sm:$0x1] }
 0x6f8   :  { %v1714_v14 = vpop.f32.mrf.mxu0 }
 0x6f9   :  { %v964_v15 = vadd.f32 %v963_v12, %v962_v9  ;;  %v971_v16 = vrot.slane %v970_v13, 2 }
 0x6fb   :  { %v965_v17 = vrot.slane %v964_v15, 1  ;;  %v972_v18 = vadd.f32 %v971_v16, %v970_v13 }
 0x6fd   :  { %v966_v19 = vadd.f32 %v965_v17, %v964_v15  ;;  %v973_v20 = vrot.slane %v972_v18, 1 }
 0x6ff   :  { %v967_v21 = vmul.f32 0.125, %v966_v19  ;;  %v974_v22 = vadd.f32 %v973_v20, %v972_v18  ;;  %v1852_v19 = vld [vmem:[#allocation2 + $0x278] sm:$0xff]   ;;  %v1853_v20 = vld [vmem:[#allocation2 + $0x270] sm:$0xff]  }
 0x701   :  { %v975_v23 = vmul.f32 0.125, %v974_v22  ;;  %v976_v24 = vmul.f32 %v967_v21, %v967_v21  ;;  %v1855_v22 = vld [vmem:[#allocation2 + $0x260] sm:$0xff]  }
 0x703   :  { %v977_v25 = vsub.f32 %v975_v23, %v976_v24  ;;  %v1856_v23 = vld [vmem:[#allocation2 + $0x258] sm:$0xff]   ;;  %v1857_v24 = vld [vmem:[#allocation2 + $0x250] sm:$0xff]  }
 0x705   :  { %v979_v26 = vadd.f32 1e-05, %v977_v25  ;;  %v1858_v25 = vld [vmem:[#allocation2 + $0x248] sm:$0xff]  }
 0x707   :  { %1872 = vrsqrt.f32 %v979_v26  ;;  %v1859_v26 = vld [vmem:[#allocation2 + $0x240] sm:$0xff]  }
 0x714   :  { %v1873_v28 = vpop.eup %1872 }
 0x715   :  { %v981_v29 = vmul.f32 %v1873_v28, %v978_v27 }
 0x717   :  { %v983_v31 = vmul.f32 %v981_v29, %v967_v21  ;;  %v988_v32 = vrot.slane %v981_v29, %v1962_v44  ;;  %v1854_v21 = vld [vmem:[#allocation2 + $0x268] sm:$0xff]  }
 0x719   :  { %v984_v33 = vsub.f32 %v982_v30, %v983_v31  ;;  %v989_v34 = vmul.f32 %v988_v32, %v955_v5 }
 0x71b   :  { %v993_v35 = vrot.slane %v984_v33, %v1962_v44 }
 0x71d   :  { %v994_v36 = vadd.f32 %v993_v35, %v989_v34 }
 0x71f   :  { %v995_v37 = vmax.f32 %v994_v36, 0.0 }
 0x721   :  { %v996_v38 = vpack.c.bf16 %v995_v37, %v995_v37 }
 0x723   :  { %1732 = vmatmul.mubr.bf16.vlgmr.msra.gmra.mxu1 %v996_v38 }
 0x724   :  { %1771 = vmatprep.mubr.msk.bf16.mxu1 %vm1906_vm0, %v1905_v0  ;;  %1756 = vmatpush3.bf16.msra.mxu1 %v1852_v19 }
 0x725   :  { %1757 = vmatprep.subr.bf16.mxu1 %v1905_v0 }
 0x728   :  { %1758 = vmatpush3.bf16.msra.mxu1 %v1853_v20 }
 0x729   :  { %1759 = vmatprep.subr.bf16.mxu1 %v1905_v0 }
 0x72c   :  { %1760 = vmatpush3.bf16.msra.mxu1 %v1854_v21 }
 0x72d   :  { %1761 = vmatprep.subr.bf16.mxu1 %v1905_v0 }
 0x730   :  { %1762 = vmatpush3.bf16.msra.mxu1 %v1855_v22 }
 0x731   :  { %1763 = vmatprep.subr.bf16.mxu1 %v1905_v0 }
 0x734   :  { %1764 = vmatpush3.bf16.msra.mxu1 %v1856_v23 }
 0x735   :  { %1765 = vmatprep.subr.bf16.mxu1 %v1905_v0 }
 0x738   :  { %1766 = vmatpush3.bf16.msra.mxu1 %v1857_v24 }
 0x739   :  { %1767 = vmatprep.subr.bf16.mxu1 %v1905_v0 }
 0x73c   :  { %1768 = vmatpush3.bf16.msra.mxu1 %v1858_v25 }
 0x73d   :  { %1769 = vmatprep.subr.bf16.mxu1 %v1905_v0 }
 0x740   :  { %1770 = vmatpush3.bf16.msra.mxu1 %v1859_v26 }
 0x7e3   :  { %v1096_v48 = vpop.f32.mrf.mxu1 }
 0x7e4   :  { %v1102_v49 = vrot.slane %v1096_v48, 4  ;;  %v1109_v50 = vmul.f32 %v1096_v48, %v1096_v48 }
 0x7e5   :  { %v1733_v51 = vpop.f32.mrf.mxu1 }
 0x7e6   :  { %v1103_v52 = vadd.f32 %v1102_v49, %v1096_v48  ;;  %v1110_v53 = vrot.slane %v1109_v50, 4  ;;  %v1260_v49 = vld [vmem:[%s2119_s2 + $0xe] sm:$0x1] }
 0x7e7   :  { %v1099_v54 = vpop.f32.mrf.mxu1 }
 0x7e8   :  { %v1104_v55 = vrot.slane %v1103_v52, 2  ;;  %v1111_v56 = vadd.f32 %v1110_v53, %v1109_v50 }
 0x7e9   :  { %v1734_v57 = vpop.f32.mrf.mxu1 }
 0x7ea   :  { %v1105_v58 = vadd.f32 %v1104_v55, %v1103_v52  ;;  %v1112_v59 = vrot.slane %v1111_v56, 2  ;;  %v1264_v52 = vld [vmem:[%s2119_s2 + $0xf] sm:$0x1] }
 0x7ec   :  { %v1106_v60 = vrot.slane %v1105_v58, 1  ;;  %v1113_v61 = vadd.f32 %v1112_v59, %v1111_v56 }
 0x7ee   :  { %v1107_v62 = vadd.f32 %v1106_v60, %v1105_v58  ;;  %v1114_v63 = vrot.slane %v1113_v61, 1 }
 0x7f0   :  { %v1108_v1 = vmul.f32 0.125, %v1107_v62  ;;  %v1115_v2 = vadd.f32 %v1114_v63, %v1113_v61  ;;  %v1475_v61 = vld [vmem:[%s2119_s2 + $0x11] ss:$0 sm:$0xff] }
 0x7f2   :  { %v1116_v3 = vmul.f32 0.125, %v1115_v2  ;;  %v1117_v4 = vmul.f32 %v1108_v1, %v1108_v1 }
 0x7f4   :  { %v1118_v5 = vsub.f32 %v1116_v3, %v1117_v4 }
 0x7f6   :  { %v1120_v6 = vadd.f32 1e-05, %v1118_v5 }
 0x7f8   :  { %1874 = vrsqrt.f32 %v1120_v6 }
 0x805   :  { %v1875_v8 = vpop.eup %1874 }
 0x806   :  { %v1122_v9 = vmul.f32 %v1875_v8, %v1119_v7 }
 0x808   :  { %v1124_v11 = vmul.f32 %v1122_v9, %v1108_v1  ;;  %v1129_v12 = vrot.slane %v1122_v9, %v1962_v44 }
 0x80a   :  { %v1125_v13 = vsub.f32 %v1123_v10, %v1124_v11  ;;  %v1130_v14 = vmul.f32 %v1129_v12, %v1096_v48 }
 0x80c   :  { %v1134_v15 = vrot.slane %v1125_v13, %v1962_v44 }
 0x80e   :  { %v1135_v16 = vadd.f32 %v1134_v15, %v1130_v14 }
 0x810   :  { %v1136_v17 = vmax.f32 %v1135_v16, 0.0 }
 0x812   :  { %v1137_v18 = vpack.c.bf16 %v1136_v17, %v1136_v17 }
 0x814   :  { %1752 = vmatmul.mubr.bf16.vlgmr.msra.gmra.mxu0 %v1137_v18 }
 0x8d4   :  { %v1237_v27 = vpop.f32.mrf.mxu0 }
 0x8d5   :  { %v1243_v28 = vrot.slane %v1237_v27, 4  ;;  %v1250_v29 = vmul.f32 %v1237_v27, %v1237_v27 }
 0x8d6   :  { %v1753_v30 = vpop.f32.mrf.mxu0 }
 0x8d7   :  { %v1244_v31 = vadd.f32 %v1243_v28, %v1237_v27  ;;  %v1251_v32 = vrot.slane %v1250_v29, 4 }
 0x8d8   :  { %v1240_v33 = vpop.f32.mrf.mxu0 }
 0x8d9   :  { %v1245_v34 = vrot.slane %v1244_v31, 2  ;;  %v1252_v35 = vadd.f32 %v1251_v32, %v1250_v29 }
 0x8da   :  { %v1754_v36 = vpop.f32.mrf.mxu0 }
 0x8db   :  { %v1246_v37 = vadd.f32 %v1245_v34, %v1244_v31  ;;  %v1253_v38 = vrot.slane %v1252_v35, 2 }
 0x8dd   :  { %v1247_v39 = vrot.slane %v1246_v37, 1  ;;  %v1254_v40 = vadd.f32 %v1253_v38, %v1252_v35 }
 0x8df   :  { %v1248_v41 = vadd.f32 %v1247_v39, %v1246_v37  ;;  %v1255_v42 = vrot.slane %v1254_v40, 1 }
 0x8e1   :  { %v1249_v43 = vmul.f32 0.125, %v1248_v41  ;;  %v1256_v0 = vadd.f32 %v1255_v42, %v1254_v40 }
 0x8e3   :  { %v1257_v45 = vmul.f32 0.125, %v1256_v0  ;;  %v1258_v46 = vmul.f32 %v1249_v43, %v1249_v43 }
 0x8e5   :  { %v1259_v47 = vsub.f32 %v1257_v45, %v1258_v46 }
 0x8e7   :  { %v1261_v48 = vadd.f32 1e-05, %v1259_v47 }
 0x8e9   :  { %1876 = vrsqrt.f32 %v1261_v48 }
 0x8f6   :  { %v1877_v50 = vpop.eup %1876 }
 0x8f7   :  { %v1263_v51 = vmul.f32 %v1877_v50, %v1260_v49 }
 0x8f9   :  { %v1265_v53 = vmul.f32 %v1263_v51, %v1249_v43  ;;  %v1270_v54 = vrot.slane %v1263_v51, %v1962_v44 }
 0x8fb   :  { %v1266_v55 = vsub.f32 %v1264_v52, %v1265_v53  ;;  %v1271_v56 = vmul.f32 %v1270_v54, %v1237_v27 }
 0x8fd   :  { %v1275_v57 = vrot.slane %v1266_v55, %v1962_v44 }
 0x8ff   :  { %v1276_v58 = vadd.f32 %v1275_v57, %v1271_v56 }
 0x901   :  { %v1277_v59 = vmax.f32 %v1276_v58, 0.0 }
 0x903   :  { %v1278_v60 = vpack.c.bf16 %v1277_v59, %v1277_v59 }
 0x905   :  { %1772 = vmatmul.mubr.bf16.vlgmr.msra.gmra.mxu1 %v1278_v60 }
 0x9c5   :  { %v1383_v62 = vpop.f32.mrf.mxu1 }
 0x9c6   :  { %v1384_v63 = vadd.f32 %v1475_v61, %v1383_v62 }
 0x9c7   :  { %v1773_v1 = vpop.f32.mrf.mxu1 }
 0x9c8   :  { %v1389_v2 = vmul.f32 0.5, %v1384_v63 }
 0x9c9   :  { %v1386_v3 = vpop.f32.mrf.mxu1 }
 0x9ca   :  { %1878 = vtanh.f32 %v1389_v2 }
 0x9cb   :  { %v1774_v4 = vpop.f32.mrf.mxu1 }
 0x9d7   :  { %v1879_v5 = vpop.eup %1878 }
 0x9d8   :  { %v1391_v6 = vmul.f32 0.5, %v1879_v5 }
 0x9da   :  { %v1392_v7 = vadd.f32 0.5, %v1391_v6 }
 0x9dc   :  { %1393 = vst [vmem:[%s2120_s3] sm:$0xff] %v1392_v7 }
 0x9dd   :  { %1400 = vsyncpa [#allocation3], 1 }

</bundles_post_ra>
